<compile_context>
chip_gen: v7x
topology: tpu7x:2x2x1
jax: 0.10.0
libtpu: 0.0.40
codegen_flags: <defaults>
</compile_context>

<pallas_src>
import jax
import jax.numpy as jnp
from jax.experimental import pallas as pl
from jax.experimental.pallas import tpu as pltpu


def _round_up(n, m):
    return (n + m - 1) // m * m


def _weight_layout(dim_z, cpad):
    """Row offsets of each parameter inside the packed (rows, cpad) slab.
    Sections are 8-row aligned so in-kernel static slices sit on sublane
    tile boundaries.  `cpad` is the 128-padded column/feature width."""
    k_in = dim_z + 4                       # [wz; wx; wy; wr; bz]
    r_in = 0
    r_w1 = _round_up(r_in + k_in, 8)
    r_b1 = _round_up(r_w1 + cpad, 8)
    r_w2 = _round_up(r_b1 + 1, 8)
    r_b2 = _round_up(r_w2 + cpad, 8)
    r_w3 = _round_up(r_b2 + 1, 8)
    r_b3 = _round_up(r_w3 + cpad, 8)
    r_wo = _round_up(r_b3 + 1, 8)
    r_bo = _round_up(r_wo + cpad, 8)
    rows = _round_up(r_bo + 1, 8)
    return dict(k_in=k_in, r_in=r_in, r_w1=r_w1, r_b1=r_b1, r_w2=r_w2,
                r_b2=r_b2, r_w3=r_w3, r_b3=r_b3, r_wo=r_wo, r_bo=r_bo,
                rows=rows)


def pack_cppn_params(params):
    """Pack all weights / biases (pre-transposed to (in, out)) into ONE f32
    (rows, cpad) slab -> a single BlockSpec / DMA.  Columns (and the K rows
    of the hidden / output layers) are zero-padded from ch / dim_c to a
    lane-dense cpad = round_up(max(ch, dim_c), 128).  Call this ONCE per
    parameter set (not per forward call)."""
    dim_z, ch = params["wz"].shape
    dim_c = params["wo"].shape[1]
    cpad = _round_up(max(ch, dim_c), 128)
    lay = _weight_layout(dim_z, cpad)

    slab = jnp.zeros((lay["rows"], cpad), jnp.float32)
    w_in = jnp.concatenate(
        [params["wz"], params["wx"], params["wy"], params["wr"], params["bz"]],
        axis=0).astype(jnp.float32)                           # (dim_z+4, ch)
    slab = slab.at[lay["r_in"]:lay["r_in"] + lay["k_in"], :ch].set(w_in)
    for wname, bname, r_w, r_b in (("w1", "b1", lay["r_w1"], lay["r_b1"]),
                                   ("w2", "b2", lay["r_w2"], lay["r_b2"]),
                                   ("w3", "b3", lay["r_w3"], lay["r_b3"])):
        slab = slab.at[r_w:r_w + ch, :ch].set(params[wname].astype(jnp.float32))
        slab = slab.at[r_b, :ch].set(params[bname][0].astype(jnp.float32))
    slab = slab.at[lay["r_wo"]:lay["r_wo"] + ch, :dim_c].set(
        params["wo"].astype(jnp.float32))
    slab = slab.at[lay["r_bo"], :dim_c].set(params["bo"][0].astype(jnp.float32))
    return slab


def _make_kernel(lay, cpad):
    k_in = lay["k_in"]

    def kernel(in_ref, w_ref, out_ref):
        w = w_ref  # single packed weight slab, resident in VMEM
        # input projection: [z|x|y|r|1] @ [wz;wx;wy;wr;bz]  (bias folded in)
        h = jnp.dot(in_ref[...], w[lay["r_in"]:lay["r_in"] + k_in, :],
                    preferred_element_type=jnp.float32)
        h = jnp.tanh(h)
        # nn_seq: (Linear -> Tanh) x 3 — all lane-dense (tile_n, cpad)
        for r_w, r_b in ((lay["r_w1"], lay["r_b1"]),
                         (lay["r_w2"], lay["r_b2"]),
                         (lay["r_w3"], lay["r_b3"])):
            h = jnp.tanh(
                jnp.dot(h, w[r_w:r_w + cpad, :],
                        preferred_element_type=jnp.float32)
                + w[r_b:r_b + 1, :])
        # output Linear (wo/bo zero-padded to cpad cols) -> Sigmoid.
        # sigmoid(o) == 0.5*(tanh(0.5*o)+1): one EUP tanh push, no divide.
        o = (jnp.dot(h, w[lay["r_wo"]:lay["r_wo"] + cpad, :],
                     preferred_element_type=jnp.float32)
             + w[lay["r_bo"]:lay["r_bo"] + 1, :])
        out_ref[...] = 0.5 * (jnp.tanh(0.5 * o) + 1.0)

    return kernel


def cppn_forward(z, x, y, r, slab, dim_c, *, tile_n=None):
    """z: (N, dim_z); x, y, r: (N, 1); slab: packed params from
    pack_cppn_params (built once, outside the hot path).  Returns (N, dim_c)."""
    N, dim_z = z.shape
    cpad = slab.shape[1]
    lay = _weight_layout(dim_z, cpad)
    assert slab.shape[0] == lay["rows"], "slab does not match layout"
    k_in = lay["k_in"]

    # Fold the four input projections (and the l_z bias) into one matmul.
    ones = jnp.ones((N, 1), jnp.float32)
    inp = jnp.concatenate([z, x, y, r, ones], axis=1).astype(jnp.float32)

    # Tile selection:
    #  * small N  -> one grid step (no per-step overhead, no padding pass)
    #  * large N  -> an even number of "parallel" row tiles (both v7x TCs),
    #    capped at 4096 rows so double-buffered 128-wide output + live
    #    activations fit v5e's 16 MiB scoped-VMEM default with headroom.
    n8 = _round_up(N, 8)
    if tile_n is None:
        if n8 <= 1024:
            tile_n = n8
        else:
            tile_n = min(4096, _round_up(pl.cdiv(n8, 2), 8))
    tile_n = _round_up(max(8, min(tile_n, n8)), 8)
    n_pad = _round_up(N, tile_n)
    if n_pad != N:
        inp = jnp.pad(inp, ((0, n_pad - N), (0, 0)))

    kernel = _make_kernel(lay, cpad)

    out = pl.pallas_call(
        kernel,
        out_shape=jax.ShapeDtypeStruct((n_pad, cpad), jnp.float32),
        grid_spec=pltpu.PrefetchScalarGridSpec(
            num_scalar_prefetch=0,
            grid=(n_pad // tile_n,),
            in_specs=[
                pl.BlockSpec((tile_n, k_in), lambda i: (i, 0)),       # coords
                pl.BlockSpec((lay["rows"], cpad), lambda i: (0, 0)),  # weights
            ],
            out_specs=pl.BlockSpec((tile_n, cpad), lambda i: (i, 0)),
        ),
        compiler_params=pltpu.CompilerParams(
            dimension_semantics=("parallel",)),
    )(inp, slab)
    return out[:N, :dim_c]


def init_cppn_params(key, dim_z, ch, dim_c):
    """weights ~ N(0, 1), biases = 0 (matches weights_init).  Weights stored
    pre-transposed as (in_features, out_features)."""
    ks = jax.random.split(key, 8)
    f32 = jnp.float32
    return {
        "wz": jax.random.normal(ks[0], (dim_z, ch), f32),
        "bz": jnp.zeros((1, ch), f32),
        "wx": jax.random.normal(ks[1], (1, ch), f32),
        "wy": jax.random.normal(ks[2], (1, ch), f32),
        "wr": jax.random.normal(ks[3], (1, ch), f32),
        "w1": jax.random.normal(ks[4], (ch, ch), f32),
        "b1": jnp.zeros((1, ch), f32),
        "w2": jax.random.normal(ks[5], (ch, ch), f32),
        "b2": jnp.zeros((1, ch), f32),
        "w3": jax.random.normal(ks[6], (ch, ch), f32),
        "b3": jnp.zeros((1, ch), f32),
        "wo": jax.random.normal(ks[7], (ch, dim_c), f32),
        "bo": jnp.zeros((1, dim_c), f32),
    }


def cppn_reference(z, x, y, r, p):
    """Faithful re-statement of the PyTorch forward (unfused op ordering)."""
    u = z @ p["wz"] + p["bz"] + x * p["wx"] + y * p["wy"] + r * p["wr"]
    h = jnp.tanh(u)
    h = jnp.tanh(h @ p["w1"] + p["b1"])
    h = jnp.tanh(h @ p["w2"] + p["b2"])
    h = jnp.tanh(h @ p["w3"] + p["b3"])
    return jax.nn.sigmoid(h @ p["wo"] + p["bo"])


def cppn_reference_fused(z, x, y, r, p):
    """Same math with the input projection fused exactly like the kernel
    (identical dot contractions -> tight numerical parity with the kernel)."""
    ones = jnp.ones((z.shape[0], 1), z.dtype)
    w_in = jnp.concatenate([p["wz"], p["wx"], p["wy"], p["wr"], p["bz"]], axis=0)
    h = jnp.tanh(jnp.concatenate([z, x, y, r, ones], axis=1) @ w_in)
    h = jnp.tanh(h @ p["w1"] + p["b1"])
    h = jnp.tanh(h @ p["w2"] + p["b2"])
    h = jnp.tanh(h @ p["w3"] + p["b3"])
    return jax.nn.sigmoid(h @ p["wo"] + p["bo"])


if __name__ == "__main__":
    # CPPN_config: dim_z=8, dim_x=dim_y=16, dim_c=3, hidden_size=32, scale=1.0
    dim_z, dim_x, dim_y, dim_c, hidden, scale = 8, 16, 16, 3, 32, 1.0
    N = dim_x * dim_y  # 256 coordinate samples

    key = jax.random.PRNGKey(0)
    k_param, k_z = jax.random.split(key)
    params = init_cppn_params(k_param, dim_z, hidden, dim_c)

    # Pack weights ONCE (hoisted out of the per-call path).
    slab = jax.block_until_ready(pack_cppn_params(params))

    # coordinate grid inputs (the usual CPPN setup)
    xs = (jnp.arange(dim_x, dtype=jnp.float32) - (dim_x - 1) / 2.0) / (dim_x - 1) * scale
    ys = (jnp.arange(dim_y, dtype=jnp.float32) - (dim_y - 1) / 2.0) / (dim_y - 1) * scale
    xg, yg = jnp.meshgrid(xs, ys, indexing="ij")
    x = xg.reshape(N, 1)
    y = yg.reshape(N, 1)
    r = jnp.sqrt(x * x + y * y)
    z = jnp.tile(jax.random.normal(k_z, (1, dim_z), jnp.float32), (N, 1))

    out = cppn_forward(z, x, y, r, slab, dim_c)
    out = jax.block_until_ready(out)
    assert out.shape == (N, dim_c)

    # Tight check vs. a structurally identical JAX formulation (zero-padded
    # columns/rows contribute exact zeros, so padding does not change math).
    ref_fused = cppn_reference_fused(z, x, y, r, params)
    assert jnp.allclose(out, ref_fused, atol=1e-5, rtol=1e-5)

    # Looser sanity check vs. the PyTorch-ordered math (tolerance covers
    # default-precision MXU f32 matmul passes across TPU generations).
    ref = cppn_reference(z, x, y, r, params)
    assert jnp.allclose(out, ref, atol=5e-3, rtol=5e-3)

    print("KERNEL_OK")
</pallas_src>

<mosaic_0001>
module attributes {stable_mosaic.version = 11 : i64} {
  func.func @kernel(%arg0: i32, %arg1: memref<256x12xf32, #tpu.memory_space<vmem>>, %arg2: memref<560x128xf32, #tpu.memory_space<vmem>>, %arg3: memref<256x128xf32, #tpu.memory_space<vmem>>) attributes {dimension_semantics = [#tpu.dimension_semantics<parallel>], iteration_bounds = array<i64: 1>, scalar_prefetch = 0 : i64, scratch_operands = 0 : i64, tpu.core_type = #tpu.core_type<tc>, window_params = [{transform_indices = @transform_0, window_bounds = array<i64: 256, 12>}, {pipeline_mode = #tpu.pipeline_mode<synchronous>, transform_indices = @transform_1, window_bounds = array<i64: 560, 128>}, {transform_indices = @transform_2, window_bounds = array<i64: 256, 128>}]} {
    %c0 = arith.constant 0 : index
    %c0_0 = arith.constant 0 : index
    %0 = vector.load %arg1[%c0, %c0_0] : memref<256x12xf32, #tpu.memory_space<vmem>>, vector<256x12xf32>
    %c0_1 = arith.constant 0 : index
    %c0_2 = arith.constant 0 : index
    %1 = vector.load %arg2[%c0_1, %c0_2] : memref<560x128xf32, #tpu.memory_space<vmem>>, vector<12x128xf32>
    %cst = arith.constant dense<0.000000e+00> : vector<256x128xf32>
    %2 = tpu.matmul %0, %1, %cst {dimension_numbers = #tpu.dot_dimension_numbers<[1], [0], [0], [1], [0, 0, 1, 1], [], []>} : vector<256x12xf32>, vector<12x128xf32>, vector<256x128xf32> -> vector<256x128xf32>
    %3 = math.tanh %2 : vector<256x128xf32>
    %c16 = arith.constant 16 : index
    %c0_3 = arith.constant 0 : index
    %4 = vector.load %arg2[%c16, %c0_3] : memref<560x128xf32, #tpu.memory_space<vmem>>, vector<128x128xf32>
    %cst_4 = arith.constant dense<0.000000e+00> : vector<256x128xf32>
    %5 = tpu.matmul %3, %4, %cst_4 {dimension_numbers = #tpu.dot_dimension_numbers<[1], [0], [0], [1], [0, 0, 1, 1], [], []>} : vector<256x128xf32>, vector<128x128xf32>, vector<256x128xf32> -> vector<256x128xf32>
    %c144 = arith.constant 144 : index
    %c0_5 = arith.constant 0 : index
    %6 = vector.load %arg2[%c144, %c0_5] : memref<560x128xf32, #tpu.memory_space<vmem>>, vector<1x128xf32>
    %7 = vector.broadcast %6 : vector<1x128xf32> to vector<256x128xf32>
    %8 = arith.addf %5, %7 : vector<256x128xf32>
    %9 = math.tanh %8 : vector<256x128xf32>
    %c152 = arith.constant 152 : index
    %c0_6 = arith.constant 0 : index
    %10 = vector.load %arg2[%c152, %c0_6] : memref<560x128xf32, #tpu.memory_space<vmem>>, vector<128x128xf32>
    %cst_7 = arith.constant dense<0.000000e+00> : vector<256x128xf32>
    %11 = tpu.matmul %9, %10, %cst_7 {dimension_numbers = #tpu.dot_dimension_numbers<[1], [0], [0], [1], [0, 0, 1, 1], [], []>} : vector<256x128xf32>, vector<128x128xf32>, vector<256x128xf32> -> vector<256x128xf32>
    %c280 = arith.constant 280 : index
    %c0_8 = arith.constant 0 : index
    %12 = vector.load %arg2[%c280, %c0_8] : memref<560x128xf32, #tpu.memory_space<vmem>>, vector<1x128xf32>
    %13 = vector.broadcast %12 : vector<1x128xf32> to vector<256x128xf32>
    %14 = arith.addf %11, %13 : vector<256x128xf32>
    %15 = math.tanh %14 : vector<256x128xf32>
    %c288 = arith.constant 288 : index
    %c0_9 = arith.constant 0 : index
    %16 = vector.load %arg2[%c288, %c0_9] : memref<560x128xf32, #tpu.memory_space<vmem>>, vector<128x128xf32>
    %cst_10 = arith.constant dense<0.000000e+00> : vector<256x128xf32>
    %17 = tpu.matmul %15, %16, %cst_10 {dimension_numbers = #tpu.dot_dimension_numbers<[1], [0], [0], [1], [0, 0, 1, 1], [], []>} : vector<256x128xf32>, vector<128x128xf32>, vector<256x128xf32> -> vector<256x128xf32>
    %c416 = arith.constant 416 : index
    %c0_11 = arith.constant 0 : index
    %18 = vector.load %arg2[%c416, %c0_11] : memref<560x128xf32, #tpu.memory_space<vmem>>, vector<1x128xf32>
    %19 = vector.broadcast %18 : vector<1x128xf32> to vector<256x128xf32>
    %20 = arith.addf %17, %19 : vector<256x128xf32>
    %21 = math.tanh %20 : vector<256x128xf32>
    %c424 = arith.constant 424 : index
    %c0_12 = arith.constant 0 : index
    %22 = vector.load %arg2[%c424, %c0_12] : memref<560x128xf32, #tpu.memory_space<vmem>>, vector<128x128xf32>
    %cst_13 = arith.constant dense<0.000000e+00> : vector<256x128xf32>
    %23 = tpu.matmul %21, %22, %cst_13 {dimension_numbers = #tpu.dot_dimension_numbers<[1], [0], [0], [1], [0, 0, 1, 1], [], []>} : vector<256x128xf32>, vector<128x128xf32>, vector<256x128xf32> -> vector<256x128xf32>
    %c552 = arith.constant 552 : index
    %c0_14 = arith.constant 0 : index
    %24 = vector.load %arg2[%c552, %c0_14] : memref<560x128xf32, #tpu.memory_space<vmem>>, vector<1x128xf32>
    %25 = vector.broadcast %24 : vector<1x128xf32> to vector<256x128xf32>
    %26 = arith.addf %23, %25 : vector<256x128xf32>
    %cst_15 = arith.constant 5.000000e-01 : f32
    %27 = vector.broadcast %cst_15 : f32 to vector<256x128xf32>
    %28 = arith.mulf %27, %26 : vector<256x128xf32>
    %29 = math.tanh %28 : vector<256x128xf32>
    %cst_16 = arith.constant 1.000000e+00 : f32
    %30 = vector.broadcast %cst_16 : f32 to vector<256x128xf32>
    %31 = arith.addf %29, %30 : vector<256x128xf32>
    %cst_17 = arith.constant 5.000000e-01 : f32
    %32 = vector.broadcast %cst_17 : f32 to vector<256x128xf32>
    %33 = arith.mulf %32, %31 : vector<256x128xf32>
    %c0_18 = arith.constant 0 : index
    %c0_19 = arith.constant 0 : index
    %34 = vector.load %arg3[%c0_18, %c0_19] : memref<256x128xf32, #tpu.memory_space<vmem>>, vector<256x128xf32>
    tpu.vector_store %arg3[%c0_18, %c0_19], %33 {strides = array<i32>} : memref<256x128xf32, #tpu.memory_space<vmem>>, vector<256x128xf32>,
    return
  }
  func.func @transform_0(%arg0: i32) -> (i32, i32) {
    %c0_i32 = arith.constant 0 : i32
    %c0_i32_0 = arith.constant 0 : i32
    return %arg0, %c0_i32 : i32, i32
  }
  func.func @transform_1(%arg0: i32) -> (i32, i32) {
    %c0_i32 = arith.constant 0 : i32
    %c0_i32_0 = arith.constant 0 : i32
    %c0_i32_1 = arith.constant 0 : i32
    return %c0_i32, %c0_i32_0 : i32, i32
  }
  func.func @transform_2(%arg0: i32) -> (i32, i32) {
    %c0_i32 = arith.constant 0 : i32
    %c0_i32_0 = arith.constant 0 : i32
    return %arg0, %c0_i32 : i32, i32
  }
}

</mosaic_0001>

<bundles_post_ra>
// kernel: tpu_custom_call.1
= control target key start
LH: loop header
LB: loop body
LE: loop exit
PB: predicated region body
PF: predicated region fallthrough
CT: control target
= control target key end

     0   :  { %7 = vsyncpa [#allocation3], 0  ;;  %s3148_s0 = inlined_call_operand.vmem [shape: f32[256,12], index: 0, kind: input, shape index: {}]   ;;  %s3149_s1 = inlined_call_operand.hbm [shape: f32[560,128], index: 1, kind: input, shape index: {}]   ;;  %s3150_s2 = inlined_call_operand.hbm [shape: f32[256,128], index: 2, kind: output, shape index: {}]  }
   0x1   :  { %8 = vsyncpa [#allocation4], 0  ;;  %s2819_s9 = smov [#allocation2]   ;;  %s2771_s13 = scalar_lea.hbm %s3149_s1, 8960 }
   0x2   :  { %s16_s10 = sshll.u32 %s2819_s9, 4  ;;  %p2772_p0 = scmp.ne.s32.totalorder %s3149_s1, %s2771_s13  ;;  %s17_s10 = int_to_ptr.vmem [resolvable:$true] %s16_s10 }
   0x3   :  { %p2775_p1 = scmp.lt.u32.totalorder %s2771_s13, %s3149_s1 }
   0x5   :  { %p2777_p2 = pnand %p2775_p1, %p2772_p0 }
   0x7   :  { %2780 = shalt.err (!%p2777_p2)
}
   0x8   :  { %s2781_s18 = scalar_lea.vmem %s17_s10, 8960  ;;  %p2786_p4 = scmp.lt.s32.totalorder %s17_s10, %s17_s10 }
   0x9   :  { %p2782_p3 = scmp.ne.s32.totalorder %s17_s10, %s2781_s18  ;;  %p2787_p5 = scmp.lt.s32.totalorder %s2781_s18, %s2781_s18 }
   0xb   :  { %p2788_p6 = por %p2787_p5, %p2786_p4 }
   0xd   :  { %p2789_p7 = pnand %p2788_p6, %p2782_p3 }
   0xf   :  { %2792 = shalt.err (!%p2789_p7)
}
  0x10   :  { %s2820_s19 = smov 128   ;;  %s2821_s20 = smov 8  }
  0x11   :  { %22 = dma.hbm_to_vmem [thread:$0]  %s3149_s1, 8960, %s17_s10, [#allocation3], %s2820_s19, %s2820_s19, %s2821_s20  }
  0x12   :  { %2815 = dma.done.wait [#allocation3], 8960  }
  0x13   :  { %2816 = vsyncadd [#allocation3], 4294958336  ;;  %vm157_vm0 = vcmask 1043456   ;;  %vm60_vm1 = vcmask 97280   ;;  %vm2822_vm2 = vmmov 1   ;;  %v58_v0 = vld [vmem:[#allocation2] sm:$0xff] }
  0x14   :  { %vm2311_vm3 = vmpackc.low %vm157_vm0, %vm2822_vm2  ;;  %v59_v1 = vld [vmem:[#allocation2 + $0x8] sm:$0xf]  ;;  %v26_v2 = vld [vmem:[%s3148_s0] sm:$0xff] }
  0x15   :  { %v2310_v3 = vpack.c.bf16 %v59_v1, %v58_v0  ;;  %1942 = vmatprep.mubr.msk.f32.mxu0 %vm60_vm1, %v26_v2  ;;  %v27_v4 = vld [vmem:[%s3148_s0 + $0x8] sm:$0xff]  ;;  %v28_v5 = vld [vmem:[%s3148_s0 + $0x10] sm:$0xff]  ;;  %v42_v6 = vld [vmem:[%s3148_s0 + $0x80] sm:$0xff] }
  0x16   :  { %v43_v7 = vld [vmem:[%s3148_s0 + $0x88] sm:$0xff]  ;;  %v44_v8 = vld [vmem:[%s3148_s0 + $0x90] sm:$0xff]  ;;  %1966 = vmatprep.mubr.msk.f32.mxu1 %vm60_vm1, %v42_v6  ;;  %v29_v9 = vld [vmem:[%s3148_s0 + $0x18] sm:$0xff] }
  0x17   :  { %2312 = vmatprep.subr.msk.bf16.mxu0 %vm2311_vm3, %v2310_v3  ;;  %2444 = vmatprep.subr.msk.bf16.mxu1 %vm2311_vm3, %v2310_v3  ;;  %v30_v10 = vld [vmem:[%s3148_s0 + $0x20] sm:$0xff]  ;;  %v45_v11 = vld [vmem:[%s3148_s0 + $0x98] sm:$0xff]  ;;  %v418_v13 = vld [vmem:[#allocation2 + $0x10] sm:$0xff] }
  0x18   :  { %2315 = vmatpush3.bf16.msk.msra.mxu0 %vm2311_vm3, %v2310_v3  ;;  %2445 = vmatpush3.bf16.msk.msra.mxu1 %vm2311_vm3, %v2310_v3  ;;  %v46_v12 = vld [vmem:[%s3148_s0 + $0xa0] sm:$0xff]  ;;  %v419_v14 = vld [vmem:[#allocation2 + $0x18] sm:$0xff]  ;;  %v31_v15 = vld [vmem:[%s3148_s0 + $0x28] sm:$0xff] }
  0x19   :  { %v2316_v16 = vpack.c.bf16 %v419_v14, %v418_v13  ;;  %v420_v17 = vld [vmem:[#allocation2 + $0x20] sm:$0xff]  ;;  %v421_v18 = vld [vmem:[#allocation2 + $0x28] sm:$0xff]  ;;  %v32_v19 = vld [vmem:[%s3148_s0 + $0x30] sm:$0xff] }
  0x1a   :  { %v47_v20 = vld [vmem:[%s3148_s0 + $0xa8] sm:$0xff]  ;;  %v2320_v21 = vpack.c.bf16 %v421_v18, %v420_v17  ;;  %v48_v22 = vld [vmem:[%s3148_s0 + $0xb0] sm:$0xff]  ;;  %v423_v24 = vld [vmem:[#allocation2 + $0x38] sm:$0xff] }
  0x1b   :  { %1943 = vmatmul.mubr.msk.f32.vlgmr.msra.gmra.mrb[0].mxu0 %vm60_vm1, %v27_v4  ;;  %1967 = vmatmul.mubr.msk.f32.vlgmr.msra.gmra.mrb[0].mxu1 %vm60_vm1, %v43_v7  ;;  %v422_v23 = vld [vmem:[#allocation2 + $0x30] sm:$0xff]  ;;  %v33_v25 = vld [vmem:[%s3148_s0 + $0x38] sm:$0xff]  ;;  %v34_v26 = vld [vmem:[%s3148_s0 + $0x40] sm:$0xff] }
  0x1c   :  { %1945 = vmatprep.mubr.msk.f32.mxu0 %vm60_vm1, %v28_v5  ;;  %1969 = vmatprep.mubr.msk.f32.mxu1 %vm60_vm1, %v44_v8  ;;  %v49_v27 = vld [vmem:[%s3148_s0 + $0xb8] sm:$0xff]  ;;  %v2324_v28 = vpack.c.bf16 %v423_v24, %v422_v23  ;;  %v50_v29 = vld [vmem:[%s3148_s0 + $0xc0] sm:$0xff]  ;;  %v425_v31 = vld [vmem:[#allocation2 + $0x48] sm:$0xff] }
  0x1d   :  { %2317 = vmatprep.subr.bf16.mxu1 %v2316_v16  ;;  %v424_v30 = vld [vmem:[#allocation2 + $0x40] sm:$0xff]  ;;  %v35_v32 = vld [vmem:[%s3148_s0 + $0x48] sm:$0xff]  ;;  %v36_v33 = vld [vmem:[%s3148_s0 + $0x50] sm:$0xff] }
  0x1e   :  { %2319 = vmatpush3.bf16.msra.mxu1 %v2316_v16  ;;  %v51_v34 = vld [vmem:[%s3148_s0 + $0xc8] sm:$0xff]  ;;  %v2328_v35 = vpack.c.bf16 %v425_v31, %v424_v30  ;;  %v52_v36 = vld [vmem:[%s3148_s0 + $0xd0] sm:$0xff]  ;;  %v427_v38 = vld [vmem:[#allocation2 + $0x58] sm:$0xff] }
  0x1f   :  { %1946 = vmatmul.mubr.msk.f32.gmra.mrb[2].mxu0 %vm60_vm1, %v29_v9  ;;  %1970 = vmatmul.mubr.msk.f32.gmra.mrb[2].mxu1 %vm60_vm1, %v45_v11  ;;  %v426_v37 = vld [vmem:[#allocation2 + $0x50] sm:$0xff]  ;;  %v37_v39 = vld [vmem:[%s3148_s0 + $0x58] sm:$0xff]  ;;  %v38_v40 = vld [vmem:[%s3148_s0 + $0x60] sm:$0xff] }
  0x20   :  { %1948 = vmatprep.mubr.msk.f32.mxu0 %vm60_vm1, %v30_v10  ;;  %1972 = vmatprep.mubr.msk.f32.mxu1 %vm60_vm1, %v46_v12  ;;  %v53_v41 = vld [vmem:[%s3148_s0 + $0xd8] sm:$0xff]  ;;  %v2332_v42 = vpack.c.bf16 %v427_v38, %v426_v37  ;;  %v54_v43 = vld [vmem:[%s3148_s0 + $0xe0] sm:$0xff]  ;;  %v39_v44 = vld [vmem:[%s3148_s0 + $0x68] sm:$0xff] }
  0x21   :  { %2321 = vmatprep.subr.bf16.mxu1 %v2320_v21  ;;  %v40_v45 = vld [vmem:[%s3148_s0 + $0x70] sm:$0xff]  ;;  %v55_v46 = vld [vmem:[%s3148_s0 + $0xe8] sm:$0xff]  ;;  %v41_v48 = vld [vmem:[%s3148_s0 + $0x78] sm:$0xff] }
  0x22   :  { %2323 = vmatpush3.bf16.msra.mxu1 %v2320_v21  ;;  %v56_v47 = vld [vmem:[%s3148_s0 + $0xf0] sm:$0xff]  ;;  %v57_v49 = vld [vmem:[%s3148_s0 + $0xf8] sm:$0xff]  ;;  %v428_v50 = vld [vmem:[#allocation2 + $0x60] sm:$0xff]  ;;  %s2823_s0 = smov [#allocation5]  }
  0x23   :  { %1949 = vmatmul.mubr.msk.f32.gmra.mrb[4].mxu0 %vm60_vm1, %v31_v15  ;;  %1973 = vmatmul.mubr.msk.f32.gmra.mrb[4].mxu1 %vm60_vm1, %v47_v20  ;;  %v429_v51 = vld [vmem:[#allocation2 + $0x68] sm:$0xff]  ;;  %v430_v53 = vld [vmem:[#allocation2 + $0x70] sm:$0xff]  ;;  %v431_v54 = vld [vmem:[#allocation2 + $0x78] sm:$0xff]  ;;  %s1663_s4 = sshll.u32 %s2823_s0, 4  ;;  %s1664_s4 = int_to_ptr.vmem [resolvable:$true] %s1663_s4 }
  0x24   :  { %1951 = vmatprep.mubr.msk.f32.mxu0 %vm60_vm1, %v32_v19  ;;  %1975 = vmatprep.mubr.msk.f32.mxu1 %vm60_vm1, %v48_v22  ;;  %v2336_v52 = vpack.c.bf16 %v429_v51, %v428_v50  ;;  %v2340_v55 = vpack.c.bf16 %v431_v54, %v430_v53  ;;  %v432_v56 = vld [vmem:[#allocation2 + $0x80] sm:$0xff]  ;;  %v433_v57 = vld [vmem:[#allocation2 + $0x88] sm:$0xff]  ;;  %v696_v59 = vld [vmem:[#allocation2 + $0x98] sm:$0xff]  ;;  %s2793_s5 = scalar_lea.vmem %s1664_s4, 4096  ;;  %p2798_p9 = scmp.lt.s32.totalorder %s1664_s4, %s1664_s4 }
  0x25   :  { %2325 = vmatprep.subr.bf16.mxu1 %v2324_v28  ;;  %v2344_v58 = vpack.c.bf16 %v433_v57, %v432_v56  ;;  %v697_v60 = vld [vmem:[#allocation2 + $0xa0] sm:$0xff]  ;;  %v698_v61 = vld [vmem:[#allocation2 + $0xa8] sm:$0xff]  ;;  %v699_v63 = vld [vmem:[#allocation2 + $0xb0] sm:$0xff]  ;;  %p2794_p8 = scmp.ne.s32.totalorder %s1664_s4, %s2793_s5  ;;  %p2799_p10 = scmp.lt.s32.totalorder %s2793_s5, %s2793_s5 }
  0x26   :  { %2327 = vmatpush3.bf16.msra.mxu1 %v2324_v28  ;;  %v2348_v62 = vpack.c.bf16 %v697_v60, %v696_v59  ;;  %v2352_v0 = vpack.c.bf16 %v699_v63, %v698_v61  ;;  %v700_v1 = vld [vmem:[#allocation2 + $0xb8] sm:$0xff]  ;;  %v701_v2 = vld [vmem:[#allocation2 + $0xc0] sm:$0xff]  ;;  %v702_v4 = vld [vmem:[#allocation2 + $0xc8] sm:$0xff] }
  0x27   :  { %1952 = vmatmul.mubr.msk.f32.gmra.mrb[6].mxu0 %vm60_vm1, %v33_v25  ;;  %1976 = vmatmul.mubr.msk.f32.gmra.mrb[6].mxu1 %vm60_vm1, %v49_v27  ;;  %v2356_v3 = vpack.c.bf16 %v701_v2, %v700_v1  ;;  %v703_v5 = vld [vmem:[#allocation2 + $0xd0] sm:$0xff]  ;;  %v704_v7 = vld [vmem:[#allocation2 + $0xd8] sm:$0xff]  ;;  %v705_v8 = vld [vmem:[#allocation2 + $0xe0] sm:$0xff]  ;;  %p2800_p11 = por %p2799_p10, %p2798_p9 }
  0x28   :  { %1954 = vmatprep.mubr.msk.f32.mxu0 %vm60_vm1, %v34_v26  ;;  %1978 = vmatprep.mubr.msk.f32.mxu1 %vm60_vm1, %v50_v29  ;;  %v2360_v6 = vpack.c.bf16 %v703_v5, %v702_v4  ;;  %v2364_v9 = vpack.c.bf16 %v705_v8, %v704_v7 }
  0x29   :  { %2329 = vmatprep.subr.bf16.mxu1 %v2328_v35  ;;  %2349 = vmatprep.subr.bf16.mxu0 %v2348_v62  ;;  %p2801_p12 = pnand %p2800_p11, %p2794_p8 }
  0x2a   :  { %2331 = vmatpush3.bf16.msra.mxu1 %v2328_v35  ;;  %2351 = vmatpush3.bf16.msra.mxu0 %v2348_v62 }
  0x2b   :  { %1955 = vmatmul.mubr.msk.f32.gmra.mrb[8].mxu0 %vm60_vm1, %v35_v32  ;;  %1979 = vmatmul.mubr.msk.f32.gmra.mrb[8].mxu1 %vm60_vm1, %v51_v34 }
  0x2c   :  { %1957 = vmatprep.mubr.msk.f32.mxu0 %vm60_vm1, %v36_v33  ;;  %1981 = vmatprep.mubr.msk.f32.mxu1 %vm60_vm1, %v52_v36 }
  0x2d   :  { %2333 = vmatprep.subr.bf16.mxu1 %v2332_v42  ;;  %2353 = vmatprep.subr.bf16.mxu0 %v2352_v0 }
  0x2e   :  { %2335 = vmatpush3.bf16.msra.mxu1 %v2332_v42  ;;  %2355 = vmatpush3.bf16.msra.mxu0 %v2352_v0 }
  0x2f   :  { %1958 = vmatmul.mubr.msk.f32.gmra.mrb[10].mxu0 %vm60_vm1, %v37_v39  ;;  %1982 = vmatmul.mubr.msk.f32.gmra.mrb[10].mxu1 %vm60_vm1, %v53_v41 }
  0x30   :  { %1960 = vmatprep.mubr.msk.f32.mxu0 %vm60_vm1, %v38_v40  ;;  %1984 = vmatprep.mubr.msk.f32.mxu1 %vm60_vm1, %v54_v43 }
  0x31   :  { %2337 = vmatprep.subr.bf16.mxu1 %v2336_v52  ;;  %2357 = vmatprep.subr.bf16.mxu0 %v2356_v3 }
  0x32   :  { %2339 = vmatpush3.bf16.msra.mxu1 %v2336_v52  ;;  %2359 = vmatpush3.bf16.msra.mxu0 %v2356_v3 }
  0x33   :  { %1961 = vmatmul.mubr.msk.f32.gmra.mrb[12].mxu0 %vm60_vm1, %v39_v44  ;;  %1985 = vmatmul.mubr.msk.f32.gmra.mrb[12].mxu1 %vm60_vm1, %v55_v46 }
  0x34   :  { %1963 = vmatprep.mubr.msk.f32.mxu0 %vm60_vm1, %v40_v45  ;;  %1987 = vmatprep.mubr.msk.f32.mxu1 %vm60_vm1, %v56_v47 }
  0x35   :  { %2341 = vmatprep.subr.bf16.mxu1 %v2340_v55  ;;  %2361 = vmatprep.subr.bf16.mxu0 %v2360_v6 }
  0x36   :  { %2343 = vmatpush3.bf16.msra.mxu1 %v2340_v55  ;;  %2363 = vmatpush3.bf16.msra.mxu0 %v2360_v6 }
  0x37   :  { %1964 = vmatmul.mubr.msk.f32.gmra.mrb[14].mxu0 %vm60_vm1, %v41_v48  ;;  %1988 = vmatmul.mubr.msk.f32.gmra.mrb[14].mxu1 %vm60_vm1, %v57_v49 }
  0x38   :  { %2345 = vmatprep.subr.bf16.mxu1 %v2344_v58  ;;  %2365 = vmatprep.subr.bf16.mxu0 %v2364_v9 }
  0x3a   :  { %2347 = vmatpush3.bf16.msra.mxu1 %v2344_v58  ;;  %2367 = vmatpush3.bf16.msra.mxu0 %v2364_v9 }
  0xee   :  { %v1944_v10 = vpop.f32.mrb[0].mxu0  ;;  %v2982_v12 = vpop.f32.mrb[0].mxu1 }
  0xef   :  { %v227_v11 = vpop.f32.mrb[1].mxu0  ;;  %v307_v13 = vpop.f32.mrb[1].mxu1 }
  0xf0   :  { %2451 = vtanh.f32 %v227_v11  ;;  %v707_v11 = vld [vmem:[#allocation2 + $0xf0] sm:$0xff] }
  0xf1   :  { %2453 = vtanh.f32 %v1944_v10  ;;  %v706_v10 = vld [vmem:[#allocation2 + $0xe8] sm:$0xff] }
  0xf2   :  { %v1947_v14 = vpop.f32.mrb[2].mxu0  ;;  %v2984_v16 = vpop.f32.mrb[2].mxu1 }
  0xf3   :  { %v237_v15 = vpop.f32.mrb[3].mxu0  ;;  %v317_v17 = vpop.f32.mrb[3].mxu1 }
  0xf4   :  { %2455 = vtanh.f32 %v237_v15 }
  0xf5   :  { %2457 = vtanh.f32 %v1947_v14  ;;  %v709_v14 = vld [vmem:[#allocation2 + $0x100] sm:$0xff] }
  0xf6   :  { %v1950_v18 = vpop.f32.mrb[4].mxu0  ;;  %v2986_v20 = vpop.f32.mrb[4].mxu1 }
  0xf7   :  { %v247_v19 = vpop.f32.mrb[5].mxu0  ;;  %v327_v21 = vpop.f32.mrb[5].mxu1 }
  0xf8   :  { %2459 = vtanh.f32 %v247_v19  ;;  %v974_v19 = vld [vmem:[#allocation2 + $0x120] sm:$0xff] }
  0xf9   :  { %2461 = vtanh.f32 %v1950_v18 }
  0xfa   :  { %v2452_v22 = vpop.eup %2451  ;;  %v1953_v23 = vpop.f32.mrb[6].mxu0 }
  0xfb   :  { %v2454_v24 = vpop.eup %2453  ;;  %v257_v25 = vpop.f32.mrb[7].mxu0  ;;  %2022 = vmatprep.mubr.f32.mxu1 %v2452_v22 }
  0xfc   :  { %v2988_v26 = vpop.f32.mrb[6].mxu1  ;;  %2463 = vtanh.f32 %v257_v25  ;;  %2023 = vmatmul.mubr.f32.vlgmr.msra.gmra.mrb[16].mxu1 %v2454_v24  ;;  %v978_v25 = vld [vmem:[#allocation2 + $0x140] sm:$0xff] }
  0xfd   :  { %v337_v27 = vpop.f32.mrb[7].mxu1  ;;  %2465 = vtanh.f32 %v1953_v23  ;;  %v977_v23 = vld [vmem:[#allocation2 + $0x138] sm:$0xff] }
  0xfe   :  { %v2456_v28 = vpop.eup %2455  ;;  %v1956_v29 = vpop.f32.mrb[8].mxu0 }
  0xff   :  { %v2458_v30 = vpop.eup %2457  ;;  %v267_v31 = vpop.f32.mrb[9].mxu0  ;;  %2025 = vmatprep.mubr.f32.mxu1 %v2456_v28  ;;  %v980_v28 = vld [vmem:[#allocation2 + $0x150] sm:$0xff] }
 0x100   :  { %v2990_v32 = vpop.f32.mrb[8].mxu1  ;;  %2467 = vtanh.f32 %v267_v31  ;;  %2026 = vmatmul.mubr.f32.gmra.mrb[18].mxu1 %v2458_v30  ;;  %v982_v31 = vld [vmem:[#allocation2 + $0x160] sm:$0xff] }
 0x101   :  { %v347_v33 = vpop.f32.mrb[9].mxu1  ;;  %2469 = vtanh.f32 %v1956_v29  ;;  %v981_v29 = vld [vmem:[#allocation2 + $0x158] sm:$0xff] }
 0x102   :  { %v2460_v34 = vpop.eup %2459  ;;  %v1959_v35 = vpop.f32.mrb[10].mxu0  ;;  %v2392_v30 = vpack.c.bf16 %v981_v29, %v980_v28 }
 0x103   :  { %v2462_v36 = vpop.eup %2461  ;;  %v277_v37 = vpop.f32.mrb[11].mxu0  ;;  %2028 = vmatprep.mubr.f32.mxu1 %v2460_v34  ;;  %v984_v34 = vld [vmem:[#allocation2 + $0x170] sm:$0xff] }
 0x104   :  { %v1983_v38 = vpop.f32.mrb[10].mxu1  ;;  %2471 = vtanh.f32 %v277_v37  ;;  %2029 = vmatmul.mubr.f32.gmra.mrb[20].mxu1 %v2462_v36  ;;  %v986_v37 = vld [vmem:[#allocation2 + $0x180] sm:$0xff] }
 0x105   :  { %v357_v39 = vpop.f32.mrb[11].mxu1  ;;  %2473 = vtanh.f32 %v1959_v35  ;;  %v985_v35 = vld [vmem:[#allocation2 + $0x178] sm:$0xff] }
 0x106   :  { %v2464_v40 = vpop.eup %2463  ;;  %v1962_v41 = vpop.f32.mrb[12].mxu0  ;;  %v2400_v36 = vpack.c.bf16 %v985_v35, %v984_v34 }
 0x107   :  { %v2466_v42 = vpop.eup %2465  ;;  %v287_v43 = vpop.f32.mrb[13].mxu0  ;;  %2031 = vmatprep.mubr.f32.mxu1 %v2464_v40  ;;  %v2997_v40 = vld [vmem:[#allocation2 + $0x90] ss:$0 sm:$0xff] }
 0x108   :  { %v1986_v44 = vpop.f32.mrb[12].mxu1  ;;  %2475 = vtanh.f32 %v287_v43  ;;  %2032 = vmatmul.mubr.f32.gmra.mrb[22].mxu1 %v2466_v42 }
 0x109   :  { %v367_v45 = vpop.f32.mrb[13].mxu1  ;;  %2477 = vtanh.f32 %v1962_v41 }
 0x10a   :  { %v2468_v46 = vpop.eup %2467  ;;  %v1965_v47 = vpop.f32.mrb[14].mxu0  ;;  %2479 = vtanh.f32 %v307_v13  ;;  %v708_v13 = vld [vmem:[#allocation2 + $0xf8] sm:$0xff] }
 0x10b   :  { %v2470_v48 = vpop.eup %2469  ;;  %v297_v49 = vpop.f32.mrb[15].mxu0  ;;  %2034 = vmatprep.mubr.f32.mxu1 %v2468_v46  ;;  %v2372_v15 = vpack.c.bf16 %v709_v14, %v708_v13 }
 0x10c   :  { %v1989_v50 = vpop.f32.mrb[14].mxu1  ;;  %2481 = vtanh.f32 %v297_v49  ;;  %2035 = vmatmul.mubr.f32.gmra.mrb[24].mxu1 %v2470_v48 }
 0x10d   :  { %v377_v51 = vpop.f32.mrb[15].mxu1  ;;  %2483 = vtanh.f32 %v1965_v47 }
 0x10e   :  { %v2472_v52 = vpop.eup %2471  ;;  %2485 = vtanh.f32 %v317_v17  ;;  %v711_v17 = vld [vmem:[#allocation2 + $0x110] sm:$0xff] }
 0x10f   :  { %v2474_v53 = vpop.eup %2473  ;;  %2037 = vmatprep.mubr.f32.mxu1 %v2472_v52  ;;  %2487 = vtanh.f32 %v2982_v12  ;;  %v2368_v12 = vpack.c.bf16 %v707_v11, %v706_v10 }
 0x110   :  { %2038 = vmatmul.mubr.f32.gmra.mrb[26].mxu1 %v2474_v53  ;;  %2489 = vtanh.f32 %v327_v21  ;;  %v976_v21 = vld [vmem:[#allocation2 + $0x130] sm:$0xff] }
 0x111   :  { %2491 = vtanh.f32 %v2984_v16  ;;  %2369 = vmatprep.subr.bf16.mxu0 %v2368_v12  ;;  %v710_v16 = vld [vmem:[#allocation2 + $0x108] sm:$0xff]  ;;  %v2384_v24 = vpack.c.bf16 %v977_v23, %v976_v21 }
 0x112   :  { %v2476_v54 = vpop.eup %2475  ;;  %2493 = vtanh.f32 %v337_v27  ;;  %2371 = vmatpush3.bf16.msra.mxu0 %v2368_v12  ;;  %v2376_v18 = vpack.c.bf16 %v711_v17, %v710_v16 }
 0x113   :  { %v2478_v55 = vpop.eup %2477  ;;  %2040 = vmatprep.mubr.f32.mxu1 %v2476_v54  ;;  %2495 = vtanh.f32 %v2986_v20  ;;  %2373 = vmatprep.subr.bf16.mxu0 %v2372_v15  ;;  %v975_v20 = vld [vmem:[#allocation2 + $0x128] sm:$0xff] }
 0x114   :  { %2041 = vmatmul.mubr.f32.gmra.mrb[28].mxu1 %v2478_v55  ;;  %v2480_v56 = vpop.eup %2479  ;;  %2497 = vtanh.f32 %v347_v33  ;;  %v2380_v22 = vpack.c.bf16 %v975_v20, %v974_v19 }
 0x115   :  { %2499 = vtanh.f32 %v2988_v26  ;;  %v979_v26 = vld [vmem:[#allocation2 + $0x148] sm:$0xff] }
 0x116   :  { %v2482_v57 = vpop.eup %2481  ;;  %2501 = vtanh.f32 %v357_v39  ;;  %2375 = vmatpush3.bf16.msra.mxu0 %v2372_v15  ;;  %2381 = vmatprep.subr.bf16.mxu1 %v2380_v22  ;;  %v2388_v27 = vpack.c.bf16 %v979_v26, %v978_v25 }
 0x117   :  { %v2484_v58 = vpop.eup %2483  ;;  %2043 = vmatprep.mubr.f32.mxu1 %v2482_v57  ;;  %2503 = vtanh.f32 %v2990_v32  ;;  %2377 = vmatprep.subr.bf16.mxu0 %v2376_v18  ;;  %v983_v32 = vld [vmem:[#allocation2 + $0x168] sm:$0xff] }
 0x118   :  { %2044 = vmatmul.mubr.f32.gmra.mrb[30].mxu1 %v2484_v58  ;;  %v2486_v59 = vpop.eup %2485  ;;  %2505 = vtanh.f32 %v367_v45  ;;  %v2396_v33 = vpack.c.bf16 %v983_v32, %v982_v31 }
 0x119   :  { %2046 = vmatprep.mubr.f32.mxu1 %v2480_v56  ;;  %v2488_v60 = vpop.eup %2487  ;;  %2507 = vtanh.f32 %v1983_v38  ;;  %2383 = vmatpush3.bf16.msra.mxu1 %v2380_v22  ;;  %v987_v38 = vld [vmem:[#allocation2 + $0x188] sm:$0xff] }
 0x11a   :  { %v2490_v61 = vpop.eup %2489  ;;  %2509 = vtanh.f32 %v377_v51  ;;  %2379 = vmatpush3.bf16.msra.mxu0 %v2376_v18  ;;  %2385 = vmatprep.subr.bf16.mxu1 %v2384_v24  ;;  %v2404_v39 = vpack.c.bf16 %v987_v38, %v986_v37 }
 0x11b   :  { %v2492_v62 = vpop.eup %2491  ;;  %2511 = vtanh.f32 %v1986_v44 }
 0x11c   :  { %2047 = vmatmul.mubr.f32.gmra.mrb[32].mxu1 %v2488_v60  ;;  %v2494_v63 = vpop.eup %2493  ;;  %2513 = vtanh.f32 %v1989_v50 }
 0x11d   :  { %2049 = vmatprep.mubr.f32.mxu1 %v2486_v59  ;;  %v2496_v0 = vpop.eup %2495  ;;  %2387 = vmatpush3.bf16.msra.mxu1 %v2384_v24 }
 0x11e   :  { %v2498_v1 = vpop.eup %2497  ;;  %2389 = vmatprep.subr.bf16.mxu1 %v2388_v27 }
 0x11f   :  { %v2500_v2 = vpop.eup %2499 }
 0x120   :  { %2050 = vmatmul.mubr.f32.gmra.mrb[34].mxu1 %v2492_v62  ;;  %v2502_v3 = vpop.eup %2501 }
 0x121   :  { %2052 = vmatprep.mubr.f32.mxu1 %v2490_v61  ;;  %v2504_v4 = vpop.eup %2503  ;;  %2391 = vmatpush3.bf16.msra.mxu1 %v2388_v27 }
 0x122   :  { %v2506_v5 = vpop.eup %2505  ;;  %2393 = vmatprep.subr.bf16.mxu1 %v2392_v30 }
 0x123   :  { %v2508_v6 = vpop.eup %2507 }
 0x124   :  { %2053 = vmatmul.mubr.f32.gmra.mrb[36].mxu1 %v2496_v0  ;;  %v2510_v7 = vpop.eup %2509 }
 0x125   :  { %2055 = vmatprep.mubr.f32.mxu1 %v2494_v63  ;;  %v2512_v8 = vpop.eup %2511  ;;  %2395 = vmatpush3.bf16.msra.mxu1 %v2392_v30 }
 0x126   :  { %v2514_v9 = vpop.eup %2513  ;;  %2397 = vmatprep.subr.bf16.mxu1 %v2396_v33 }
 0x128   :  { %2056 = vmatmul.mubr.f32.gmra.mrb[38].mxu1 %v2500_v2 }
 0x129   :  { %2058 = vmatprep.mubr.f32.mxu1 %v2498_v1  ;;  %2399 = vmatpush3.bf16.msra.mxu1 %v2396_v33 }
 0x12a   :  { %2401 = vmatprep.subr.bf16.mxu1 %v2400_v36 }
 0x12c   :  { %2059 = vmatmul.mubr.f32.gmra.mrb[40].mxu1 %v2504_v4 }
 0x12d   :  { %2061 = vmatprep.mubr.f32.mxu1 %v2502_v3  ;;  %2403 = vmatpush3.bf16.msra.mxu1 %v2400_v36 }
 0x12e   :  { %2405 = vmatprep.subr.bf16.mxu1 %v2404_v39 }
 0x130   :  { %2062 = vmatmul.mubr.f32.gmra.mrb[42].mxu1 %v2508_v6 }
 0x131   :  { %2064 = vmatprep.mubr.f32.mxu1 %v2506_v5  ;;  %2407 = vmatpush3.bf16.msra.mxu1 %v2404_v39 }
 0x134   :  { %2065 = vmatmul.mubr.f32.gmra.mrb[44].mxu1 %v2512_v8 }
 0x135   :  { %2067 = vmatprep.mubr.f32.mxu1 %v2510_v7 }
 0x138   :  { %2068 = vmatmul.mubr.f32.gmra.mrb[46].mxu1 %v2514_v9 }
 0x1cf   :  { %v2024_v41 = vpop.f32.mrb[16].mxu1 }
 0x1d0   :  { %v511_v42 = vadd.f32 %v2024_v41, %v2997_v40  ;;  %v505_v43 = vpop.f32.mrb[17].mxu1 }
 0x1d1   :  { %v506_v44 = vadd.f32 %v2997_v40, %v505_v43 }
 0x1d3   :  { %2515 = vtanh.f32 %v506_v44  ;;  %v2027_v45 = vpop.f32.mrb[18].mxu1 }
 0x1d4   :  { %2517 = vtanh.f32 %v511_v42  ;;  %v521_v46 = vadd.f32 %v2027_v45, %v2997_v40  ;;  %v515_v47 = vpop.f32.mrb[19].mxu1 }
 0x1d5   :  { %v516_v48 = vadd.f32 %v2997_v40, %v515_v47 }
 0x1d7   :  { %2519 = vtanh.f32 %v516_v48  ;;  %v2030_v49 = vpop.f32.mrb[20].mxu1 }
 0x1d8   :  { %2521 = vtanh.f32 %v521_v46  ;;  %v531_v50 = vadd.f32 %v2030_v49, %v2997_v40  ;;  %v525_v51 = vpop.f32.mrb[21].mxu1 }
 0x1d9   :  { %v526_v52 = vadd.f32 %v2997_v40, %v525_v51 }
 0x1db   :  { %2523 = vtanh.f32 %v526_v52  ;;  %v2033_v53 = vpop.f32.mrb[22].mxu1 }
 0x1dc   :  { %2525 = vtanh.f32 %v531_v50  ;;  %v541_v54 = vadd.f32 %v2033_v53, %v2997_v40  ;;  %v535_v55 = vpop.f32.mrb[23].mxu1 }
 0x1dd   :  { %v2516_v56 = vpop.eup %2515  ;;  %v536_v57 = vadd.f32 %v2997_v40, %v535_v55 }
 0x1de   :  { %v2518_v58 = vpop.eup %2517  ;;  %2102 = vmatprep.mubr.f32.mxu0 %v2516_v56 }
 0x1df   :  { %2527 = vtanh.f32 %v536_v57  ;;  %v2036_v59 = vpop.f32.mrb[24].mxu1  ;;  %2103 = vmatmul.mubr.f32.vlgmr.msra.gmra.mrb[16].mxu0 %v2518_v58 }
 0x1e0   :  { %2529 = vtanh.f32 %v541_v54  ;;  %v551_v60 = vadd.f32 %v2036_v59, %v2997_v40  ;;  %v545_v61 = vpop.f32.mrb[25].mxu1 }
 0x1e1   :  { %v2520_v62 = vpop.eup %2519  ;;  %v546_v63 = vadd.f32 %v2997_v40, %v545_v61 }
 0x1e2   :  { %v2522_v0 = vpop.eup %2521  ;;  %2105 = vmatprep.mubr.f32.mxu0 %v2520_v62 }
 0x1e3   :  { %2531 = vtanh.f32 %v546_v63  ;;  %v2039_v1 = vpop.f32.mrb[26].mxu1  ;;  %2106 = vmatmul.mubr.f32.gmra.mrb[18].mxu0 %v2522_v0 }
 0x1e4   :  { %2533 = vtanh.f32 %v551_v60  ;;  %v561_v2 = vadd.f32 %v2039_v1, %v2997_v40  ;;  %v555_v3 = vpop.f32.mrb[27].mxu1 }
 0x1e5   :  { %v2524_v4 = vpop.eup %2523  ;;  %v556_v5 = vadd.f32 %v2997_v40, %v555_v3 }
 0x1e6   :  { %v2526_v6 = vpop.eup %2525  ;;  %2108 = vmatprep.mubr.f32.mxu0 %v2524_v4 }
 0x1e7   :  { %2535 = vtanh.f32 %v556_v5  ;;  %v2042_v7 = vpop.f32.mrb[28].mxu1  ;;  %2109 = vmatmul.mubr.f32.gmra.mrb[20].mxu0 %v2526_v6 }
 0x1e8   :  { %2537 = vtanh.f32 %v561_v2  ;;  %v571_v8 = vadd.f32 %v2042_v7, %v2997_v40  ;;  %v565_v9 = vpop.f32.mrb[29].mxu1 }
 0x1e9   :  { %v2528_v10 = vpop.eup %2527  ;;  %v566_v11 = vadd.f32 %v2997_v40, %v565_v9 }
 0x1ea   :  { %v2530_v12 = vpop.eup %2529  ;;  %2111 = vmatprep.mubr.f32.mxu0 %v2528_v10  ;;  %v988_v10 = vld [vmem:[#allocation2 + $0x190] sm:$0xff] }
 0x1eb   :  { %2539 = vtanh.f32 %v566_v11  ;;  %v2045_v13 = vpop.f32.mrb[30].mxu1  ;;  %2112 = vmatmul.mubr.f32.gmra.mrb[22].mxu0 %v2530_v12  ;;  %v989_v11 = vld [vmem:[#allocation2 + $0x198] sm:$0xff]  ;;  %v1252_v12 = vld [vmem:[#allocation2 + $0x1a8] sm:$0xff] }
 0x1ec   :  { %2541 = vtanh.f32 %v571_v8  ;;  %v581_v14 = vadd.f32 %v2045_v13, %v2997_v40  ;;  %v575_v15 = vpop.f32.mrb[31].mxu1  ;;  %v1253_v13 = vld [vmem:[#allocation2 + $0x1b0] sm:$0xff] }
 0x1ed   :  { %v2532_v16 = vpop.eup %2531  ;;  %v576_v17 = vadd.f32 %v2997_v40, %v575_v15  ;;  %v2412_v15 = vpack.c.bf16 %v1253_v13, %v1252_v12 }
 0x1ee   :  { %v2534_v18 = vpop.eup %2533  ;;  %2114 = vmatprep.mubr.f32.mxu0 %v2532_v16  ;;  %v1255_v16 = vld [vmem:[#allocation2 + $0x1c0] sm:$0xff] }
 0x1ef   :  { %2543 = vtanh.f32 %v576_v17  ;;  %v2048_v19 = vpop.f32.mrb[32].mxu1  ;;  %2115 = vmatmul.mubr.f32.gmra.mrb[24].mxu0 %v2534_v18  ;;  %v1256_v18 = vld [vmem:[#allocation2 + $0x1c8] sm:$0xff]  ;;  %2413 = vmatprep.subr.bf16.mxu0 %v2412_v15 }
 0x1f0   :  { %2545 = vtanh.f32 %v581_v14  ;;  %v591_v20 = vadd.f32 %v2048_v19, %v2997_v40  ;;  %v585_v21 = vpop.f32.mrb[33].mxu1  ;;  %v1254_v14 = vld [vmem:[#allocation2 + $0x1b8] sm:$0xff]  ;;  %v1257_v19 = vld [vmem:[#allocation2 + $0x1d0] sm:$0xff]  ;;  %2415 = vmatpush3.bf16.msra.mxu0 %v2412_v15 }
 0x1f1   :  { %v2536_v22 = vpop.eup %2535  ;;  %v586_v23 = vadd.f32 %v2997_v40, %v585_v21  ;;  %v2416_v17 = vpack.c.bf16 %v1255_v16, %v1254_v14  ;;  %v1258_v21 = vld [vmem:[#allocation2 + $0x1d8] sm:$0xff] }
 0x1f2   :  { %v2538_v24 = vpop.eup %2537  ;;  %2117 = vmatprep.mubr.f32.mxu0 %v2536_v22  ;;  %v1259_v22 = vld [vmem:[#allocation2 + $0x1e0] sm:$0xff] }
 0x1f3   :  { %2547 = vtanh.f32 %v586_v23  ;;  %v2051_v25 = vpop.f32.mrb[34].mxu1  ;;  %2118 = vmatmul.mubr.f32.gmra.mrb[26].mxu0 %v2538_v24  ;;  %2417 = vmatprep.subr.bf16.mxu0 %v2416_v17  ;;  %v2424_v23 = vpack.c.bf16 %v1259_v22, %v1258_v21  ;;  %v1260_v24 = vld [vmem:[#allocation2 + $0x1e8] sm:$0xff] }
 0x1f4   :  { %2549 = vtanh.f32 %v591_v20  ;;  %v601_v26 = vadd.f32 %v2051_v25, %v2997_v40  ;;  %v595_v27 = vpop.f32.mrb[35].mxu1  ;;  %v2420_v20 = vpack.c.bf16 %v1257_v19, %v1256_v18  ;;  %2419 = vmatpush3.bf16.msra.mxu0 %v2416_v17  ;;  %v1261_v25 = vld [vmem:[#allocation2 + $0x1f0] sm:$0xff] }
 0x1f5   :  { %v2540_v28 = vpop.eup %2539  ;;  %v596_v29 = vadd.f32 %v2997_v40, %v595_v27  ;;  %v1262_v27 = vld [vmem:[#allocation2 + $0x1f8] sm:$0xff] }
 0x1f6   :  { %v2542_v30 = vpop.eup %2541  ;;  %2120 = vmatprep.mubr.f32.mxu0 %v2540_v28  ;;  %2421 = vmatprep.subr.bf16.mxu0 %v2420_v20  ;;  %v1263_v28 = vld [vmem:[#allocation2 + $0x200] sm:$0xff] }
 0x1f7   :  { %2551 = vtanh.f32 %v596_v29  ;;  %v2054_v31 = vpop.f32.mrb[36].mxu1  ;;  %2121 = vmatmul.mubr.f32.gmra.mrb[28].mxu0 %v2542_v30  ;;  %v2432_v29 = vpack.c.bf16 %v1263_v28, %v1262_v27  ;;  %v1264_v30 = vld [vmem:[#allocation2 + $0x208] sm:$0xff] }
 0x1f8   :  { %2553 = vtanh.f32 %v601_v26  ;;  %v611_v32 = vadd.f32 %v2054_v31, %v2997_v40  ;;  %v605_v33 = vpop.f32.mrb[37].mxu1  ;;  %2423 = vmatpush3.bf16.msra.mxu0 %v2420_v20  ;;  %v2428_v26 = vpack.c.bf16 %v1261_v25, %v1260_v24  ;;  %v1265_v31 = vld [vmem:[#allocation2 + $0x210] sm:$0xff] }
 0x1f9   :  { %v2544_v34 = vpop.eup %2543  ;;  %v606_v35 = vadd.f32 %v2997_v40, %v605_v33  ;;  %2425 = vmatprep.subr.bf16.mxu0 %v2424_v23  ;;  %v3031_v33 = vld [vmem:[#allocation2 + $0x118] ss:$0 sm:$0xff] }
 0x1fa   :  { %v2546_v36 = vpop.eup %2545  ;;  %2123 = vmatprep.mubr.f32.mxu0 %v2544_v34 }
 0x1fb   :  { %2555 = vtanh.f32 %v606_v35  ;;  %v2057_v37 = vpop.f32.mrb[38].mxu1  ;;  %2124 = vmatmul.mubr.f32.gmra.mrb[30].mxu0 %v2546_v36 }
 0x1fc   :  { %2557 = vtanh.f32 %v611_v32  ;;  %v621_v38 = vadd.f32 %v2057_v37, %v2997_v40  ;;  %v615_v39 = vpop.f32.mrb[39].mxu1  ;;  %2427 = vmatpush3.bf16.msra.mxu0 %v2424_v23  ;;  %v2436_v32 = vpack.c.bf16 %v1265_v31, %v1264_v30 }
 0x1fd   :  { %v2548_v41 = vpop.eup %2547  ;;  %v616_v42 = vadd.f32 %v2997_v40, %v615_v39  ;;  %2429 = vmatprep.subr.bf16.mxu0 %v2428_v26 }
 0x1fe   :  { %v2550_v43 = vpop.eup %2549  ;;  %2126 = vmatprep.mubr.f32.mxu0 %v2548_v41 }
 0x1ff   :  { %2559 = vtanh.f32 %v616_v42  ;;  %v2060_v44 = vpop.f32.mrb[40].mxu1  ;;  %2127 = vmatmul.mubr.f32.gmra.mrb[32].mxu0 %v2550_v43 }
 0x200   :  { %2561 = vtanh.f32 %v621_v38  ;;  %v631_v45 = vadd.f32 %v2060_v44, %v2997_v40  ;;  %v625_v46 = vpop.f32.mrb[41].mxu1  ;;  %2431 = vmatpush3.bf16.msra.mxu0 %v2428_v26 }
 0x201   :  { %v2552_v47 = vpop.eup %2551  ;;  %v626_v48 = vadd.f32 %v2997_v40, %v625_v46  ;;  %2433 = vmatprep.subr.bf16.mxu0 %v2432_v29 }
 0x202   :  { %v2554_v49 = vpop.eup %2553  ;;  %2129 = vmatprep.mubr.f32.mxu0 %v2552_v47 }
 0x203   :  { %2563 = vtanh.f32 %v626_v48  ;;  %v2063_v50 = vpop.f32.mrb[42].mxu1  ;;  %2130 = vmatmul.mubr.f32.gmra.mrb[34].mxu0 %v2554_v49 }
 0x204   :  { %2565 = vtanh.f32 %v631_v45  ;;  %v641_v51 = vadd.f32 %v2063_v50, %v2997_v40  ;;  %v635_v52 = vpop.f32.mrb[43].mxu1  ;;  %2435 = vmatpush3.bf16.msra.mxu0 %v2432_v29 }
 0x205   :  { %v2556_v53 = vpop.eup %2555  ;;  %v636_v54 = vadd.f32 %v2997_v40, %v635_v52  ;;  %2437 = vmatprep.subr.bf16.mxu0 %v2436_v32 }
 0x206   :  { %v2558_v55 = vpop.eup %2557  ;;  %2132 = vmatprep.mubr.f32.mxu0 %v2556_v53 }
 0x207   :  { %2567 = vtanh.f32 %v636_v54  ;;  %v2066_v56 = vpop.f32.mrb[44].mxu1  ;;  %2133 = vmatmul.mubr.f32.gmra.mrb[36].mxu0 %v2558_v55 }
 0x208   :  { %2569 = vtanh.f32 %v641_v51  ;;  %v651_v57 = vadd.f32 %v2066_v56, %v2997_v40  ;;  %v645_v58 = vpop.f32.mrb[45].mxu1  ;;  %2439 = vmatpush3.bf16.msra.mxu0 %v2436_v32 }
 0x209   :  { %v2560_v59 = vpop.eup %2559  ;;  %v646_v60 = vadd.f32 %v2997_v40, %v645_v58 }
 0x20a   :  { %v2562_v61 = vpop.eup %2561  ;;  %2135 = vmatprep.mubr.f32.mxu0 %v2560_v59 }
 0x20b   :  { %2571 = vtanh.f32 %v646_v60  ;;  %v2069_v62 = vpop.f32.mrb[46].mxu1  ;;  %2136 = vmatmul.mubr.f32.gmra.mrb[38].mxu0 %v2562_v61 }
 0x20c   :  { %2573 = vtanh.f32 %v651_v57  ;;  %v661_v63 = vadd.f32 %v2069_v62, %v2997_v40  ;;  %v655_v0 = vpop.f32.mrb[47].mxu1 }
 0x20d   :  { %v2564_v1 = vpop.eup %2563  ;;  %v656_v2 = vadd.f32 %v2997_v40, %v655_v0  ;;  %v2408_v40 = vpack.c.bf16 %v989_v11, %v988_v10 }
 0x20e   :  { %v2566_v3 = vpop.eup %2565  ;;  %2138 = vmatprep.mubr.f32.mxu0 %v2564_v1 }
 0x20f   :  { %2575 = vtanh.f32 %v656_v2  ;;  %2139 = vmatmul.mubr.f32.gmra.mrb[40].mxu0 %v2566_v3  ;;  %2409 = vmatprep.subr.bf16.mxu1 %v2408_v40 }
 0x210   :  { %2577 = vtanh.f32 %v661_v63  ;;  %2411 = vmatpush3.bf16.msra.mxu1 %v2408_v40 }
 0x211   :  { %v2568_v4 = vpop.eup %2567 }
 0x212   :  { %v2570_v5 = vpop.eup %2569  ;;  %2141 = vmatprep.mubr.f32.mxu0 %v2568_v4 }
 0x213   :  { %2142 = vmatmul.mubr.f32.gmra.mrb[42].mxu0 %v2570_v5 }
 0x215   :  { %v2572_v6 = vpop.eup %2571 }
 0x216   :  { %v2574_v7 = vpop.eup %2573  ;;  %2144 = vmatprep.mubr.f32.mxu0 %v2572_v6 }
 0x217   :  { %2145 = vmatmul.mubr.f32.gmra.mrb[44].mxu0 %v2574_v7 }
 0x219   :  { %v2576_v8 = vpop.eup %2575 }
 0x21a   :  { %v2578_v9 = vpop.eup %2577  ;;  %2147 = vmatprep.mubr.f32.mxu0 %v2576_v8 }
 0x21b   :  { %2148 = vmatmul.mubr.f32.gmra.mrb[46].mxu0 %v2578_v9 }
 0x2b2   :  { %v2104_v34 = vpop.f32.mrb[16].mxu0 }
 0x2b3   :  { %v789_v35 = vadd.f32 %v2104_v34, %v3031_v33  ;;  %v783_v36 = vpop.f32.mrb[17].mxu0 }
 0x2b4   :  { %v784_v37 = vadd.f32 %v3031_v33, %v783_v36 }
 0x2b6   :  { %2579 = vtanh.f32 %v784_v37  ;;  %v2107_v38 = vpop.f32.mrb[18].mxu0 }
 0x2b7   :  { %2581 = vtanh.f32 %v789_v35  ;;  %v799_v39 = vadd.f32 %v2107_v38, %v3031_v33  ;;  %v793_v41 = vpop.f32.mrb[19].mxu0 }
 0x2b8   :  { %v794_v42 = vadd.f32 %v3031_v33, %v793_v41 }
 0x2ba   :  { %2583 = vtanh.f32 %v794_v42  ;;  %v2110_v43 = vpop.f32.mrb[20].mxu0 }
 0x2bb   :  { %2585 = vtanh.f32 %v799_v39  ;;  %v809_v44 = vadd.f32 %v2110_v43, %v3031_v33  ;;  %v803_v45 = vpop.f32.mrb[21].mxu0 }
 0x2bc   :  { %v804_v46 = vadd.f32 %v3031_v33, %v803_v45 }
 0x2be   :  { %2587 = vtanh.f32 %v804_v46  ;;  %v2113_v47 = vpop.f32.mrb[22].mxu0 }
 0x2bf   :  { %2589 = vtanh.f32 %v809_v44  ;;  %v819_v48 = vadd.f32 %v2113_v47, %v3031_v33  ;;  %v813_v49 = vpop.f32.mrb[23].mxu0 }
 0x2c0   :  { %v2580_v50 = vpop.eup %2579  ;;  %v814_v51 = vadd.f32 %v3031_v33, %v813_v49 }
 0x2c1   :  { %v2582_v52 = vpop.eup %2581  ;;  %2182 = vmatprep.mubr.f32.mxu1 %v2580_v50 }
 0x2c2   :  { %2591 = vtanh.f32 %v814_v51  ;;  %v2116_v53 = vpop.f32.mrb[24].mxu0  ;;  %2183 = vmatmul.mubr.f32.vlgmr.msra.gmra.mrb[48].mxu1 %v2582_v52 }
 0x2c3   :  { %2593 = vtanh.f32 %v819_v48  ;;  %v829_v54 = vadd.f32 %v2116_v53, %v3031_v33  ;;  %v823_v55 = vpop.f32.mrb[25].mxu0 }
 0x2c4   :  { %v2584_v56 = vpop.eup %2583  ;;  %v824_v57 = vadd.f32 %v3031_v33, %v823_v55 }
 0x2c5   :  { %v2586_v58 = vpop.eup %2585  ;;  %2185 = vmatprep.mubr.f32.mxu1 %v2584_v56 }
 0x2c6   :  { %2595 = vtanh.f32 %v824_v57  ;;  %v2119_v59 = vpop.f32.mrb[26].mxu0  ;;  %2186 = vmatmul.mubr.f32.gmra.mrb[50].mxu1 %v2586_v58 }
 0x2c7   :  { %2597 = vtanh.f32 %v829_v54  ;;  %v839_v60 = vadd.f32 %v2119_v59, %v3031_v33  ;;  %v833_v61 = vpop.f32.mrb[27].mxu0 }
 0x2c8   :  { %v2588_v62 = vpop.eup %2587  ;;  %v834_v63 = vadd.f32 %v3031_v33, %v833_v61 }
 0x2c9   :  { %v2590_v0 = vpop.eup %2589  ;;  %2188 = vmatprep.mubr.f32.mxu1 %v2588_v62 }
 0x2ca   :  { %2599 = vtanh.f32 %v834_v63  ;;  %v2122_v1 = vpop.f32.mrb[28].mxu0  ;;  %2189 = vmatmul.mubr.f32.gmra.mrb[52].mxu1 %v2590_v0 }
 0x2cb   :  { %2601 = vtanh.f32 %v839_v60  ;;  %v849_v2 = vadd.f32 %v2122_v1, %v3031_v33  ;;  %v843_v3 = vpop.f32.mrb[29].mxu0 }
 0x2cc   :  { %v2592_v4 = vpop.eup %2591  ;;  %v844_v5 = vadd.f32 %v3031_v33, %v843_v3 }
 0x2cd   :  { %v2594_v6 = vpop.eup %2593  ;;  %2191 = vmatprep.mubr.f32.mxu1 %v2592_v4  ;;  %v1266_v4 = vld [vmem:[#allocation2 + $0x218] sm:$0xff] }
 0x2ce   :  { %2603 = vtanh.f32 %v844_v5  ;;  %v2125_v7 = vpop.f32.mrb[30].mxu0  ;;  %2192 = vmatmul.mubr.f32.gmra.mrb[54].mxu1 %v2594_v6  ;;  %v1267_v5 = vld [vmem:[#allocation2 + $0x220] sm:$0xff] }
 0x2cf   :  { %2605 = vtanh.f32 %v849_v2  ;;  %v859_v8 = vadd.f32 %v2125_v7, %v3031_v33  ;;  %v853_v9 = vpop.f32.mrb[31].mxu0  ;;  %v3065_v6 = vld [vmem:[#allocation2 + $0x1a0] ss:$0 sm:$0xff] }
 0x2d0   :  { %v2596_v10 = vpop.eup %2595  ;;  %v854_v11 = vadd.f32 %v3031_v33, %v853_v9 }
 0x2d1   :  { %v2598_v40 = vpop.eup %2597  ;;  %2194 = vmatprep.mubr.f32.mxu1 %v2596_v10 }
 0x2d2   :  { %2607 = vtanh.f32 %v854_v11  ;;  %v2128_v12 = vpop.f32.mrb[32].mxu0  ;;  %2195 = vmatmul.mubr.f32.gmra.mrb[56].mxu1 %v2598_v40 }
 0x2d3   :  { %2609 = vtanh.f32 %v859_v8  ;;  %v869_v13 = vadd.f32 %v2128_v12, %v3031_v33  ;;  %v863_v14 = vpop.f32.mrb[33].mxu0 }
 0x2d4   :  { %v2600_v15 = vpop.eup %2599  ;;  %v864_v16 = vadd.f32 %v3031_v33, %v863_v14 }
 0x2d5   :  { %v2602_v17 = vpop.eup %2601  ;;  %2197 = vmatprep.mubr.f32.mxu1 %v2600_v15 }
 0x2d6   :  { %2611 = vtanh.f32 %v864_v16  ;;  %v2131_v18 = vpop.f32.mrb[34].mxu0  ;;  %2198 = vmatmul.mubr.f32.gmra.mrb[58].mxu1 %v2602_v17 }
 0x2d7   :  { %2613 = vtanh.f32 %v869_v13  ;;  %v879_v19 = vadd.f32 %v2131_v18, %v3031_v33  ;;  %v873_v20 = vpop.f32.mrb[35].mxu0 }
 0x2d8   :  { %v2604_v21 = vpop.eup %2603  ;;  %v874_v22 = vadd.f32 %v3031_v33, %v873_v20 }
 0x2d9   :  { %v2606_v23 = vpop.eup %2605  ;;  %2200 = vmatprep.mubr.f32.mxu1 %v2604_v21 }
 0x2da   :  { %2615 = vtanh.f32 %v874_v22  ;;  %v2134_v24 = vpop.f32.mrb[36].mxu0  ;;  %2201 = vmatmul.mubr.f32.gmra.mrb[60].mxu1 %v2606_v23 }
 0x2db   :  { %2617 = vtanh.f32 %v879_v19  ;;  %v889_v25 = vadd.f32 %v2134_v24, %v3031_v33  ;;  %v883_v26 = vpop.f32.mrb[37].mxu0 }
 0x2dc   :  { %v2608_v27 = vpop.eup %2607  ;;  %v884_v28 = vadd.f32 %v3031_v33, %v883_v26 }
 0x2dd   :  { %v2610_v29 = vpop.eup %2609  ;;  %2203 = vmatprep.mubr.f32.mxu1 %v2608_v27 }
 0x2de   :  { %2619 = vtanh.f32 %v884_v28  ;;  %v2137_v30 = vpop.f32.mrb[38].mxu0  ;;  %2204 = vmatmul.mubr.f32.gmra.mrb[62].mxu1 %v2610_v29 }
 0x2df   :  { %2621 = vtanh.f32 %v889_v25  ;;  %v899_v31 = vadd.f32 %v2137_v30, %v3031_v33  ;;  %v893_v32 = vpop.f32.mrb[39].mxu0 }
 0x2e0   :  { %v2612_v34 = vpop.eup %2611  ;;  %v894_v35 = vadd.f32 %v3031_v33, %v893_v32 }
 0x2e1   :  { %v2614_v36 = vpop.eup %2613  ;;  %2206 = vmatprep.mubr.f32.mxu1 %v2612_v34 }
 0x2e2   :  { %2623 = vtanh.f32 %v894_v35  ;;  %v2140_v37 = vpop.f32.mrb[40].mxu0  ;;  %2207 = vmatmul.mubr.f32.gmra.mrb[64].mxu1 %v2614_v36 }
 0x2e3   :  { %2625 = vtanh.f32 %v899_v31  ;;  %v909_v38 = vadd.f32 %v2140_v37, %v3031_v33  ;;  %v903_v39 = vpop.f32.mrb[41].mxu0 }
 0x2e4   :  { %v2616_v41 = vpop.eup %2615  ;;  %v904_v42 = vadd.f32 %v3031_v33, %v903_v39 }
 0x2e5   :  { %v2618_v43 = vpop.eup %2617  ;;  %2209 = vmatprep.mubr.f32.mxu1 %v2616_v41 }
 0x2e6   :  { %2627 = vtanh.f32 %v904_v42  ;;  %v2143_v44 = vpop.f32.mrb[42].mxu0  ;;  %2210 = vmatmul.mubr.f32.gmra.mrb[66].mxu1 %v2618_v43 }
 0x2e7   :  { %2629 = vtanh.f32 %v909_v38  ;;  %v919_v45 = vadd.f32 %v2143_v44, %v3031_v33  ;;  %v913_v46 = vpop.f32.mrb[43].mxu0 }
 0x2e8   :  { %v2620_v47 = vpop.eup %2619  ;;  %v914_v48 = vadd.f32 %v3031_v33, %v913_v46 }
 0x2e9   :  { %v2622_v49 = vpop.eup %2621  ;;  %2212 = vmatprep.mubr.f32.mxu1 %v2620_v47 }
 0x2ea   :  { %2631 = vtanh.f32 %v914_v48  ;;  %v2146_v50 = vpop.f32.mrb[44].mxu0  ;;  %2213 = vmatmul.mubr.f32.gmra.mrb[68].mxu1 %v2622_v49 }
 0x2eb   :  { %2633 = vtanh.f32 %v919_v45  ;;  %v929_v51 = vadd.f32 %v2146_v50, %v3031_v33  ;;  %v923_v52 = vpop.f32.mrb[45].mxu0 }
 0x2ec   :  { %v2624_v53 = vpop.eup %2623  ;;  %v924_v54 = vadd.f32 %v3031_v33, %v923_v52 }
 0x2ed   :  { %v2626_v55 = vpop.eup %2625  ;;  %2215 = vmatprep.mubr.f32.mxu1 %v2624_v53 }
 0x2ee   :  { %2635 = vtanh.f32 %v924_v54  ;;  %v2149_v56 = vpop.f32.mrb[46].mxu0  ;;  %2216 = vmatmul.mubr.f32.gmra.mrb[70].mxu1 %v2626_v55 }
 0x2ef   :  { %2637 = vtanh.f32 %v929_v51  ;;  %v939_v57 = vadd.f32 %v2149_v56, %v3031_v33  ;;  %v933_v58 = vpop.f32.mrb[47].mxu0 }
 0x2f0   :  { %v2628_v59 = vpop.eup %2627  ;;  %v934_v60 = vadd.f32 %v3031_v33, %v933_v58  ;;  %v2440_v33 = vpack.c.bf16 %v1267_v5, %v1266_v4 }
 0x2f1   :  { %v2630_v61 = vpop.eup %2629  ;;  %2218 = vmatprep.mubr.f32.mxu1 %v2628_v59 }
 0x2f2   :  { %2639 = vtanh.f32 %v934_v60  ;;  %2219 = vmatmul.mubr.f32.gmra.mrb[72].mxu1 %v2630_v61  ;;  %2441 = vmatprep.subr.bf16.mxu0 %v2440_v33 }
 0x2f3   :  { %2641 = vtanh.f32 %v939_v57  ;;  %2443 = vmatpush3.bf16.msra.mxu0 %v2440_v33 }
 0x2f4   :  { %v2632_v62 = vpop.eup %2631 }
 0x2f5   :  { %v2634_v63 = vpop.eup %2633  ;;  %2221 = vmatprep.mubr.f32.mxu1 %v2632_v62 }
 0x2f6   :  { %2222 = vmatmul.mubr.f32.gmra.mrb[74].mxu1 %v2634_v63 }
 0x2f8   :  { %v2636_v0 = vpop.eup %2635 }
 0x2f9   :  { %v2638_v1 = vpop.eup %2637  ;;  %2224 = vmatprep.mubr.f32.mxu1 %v2636_v0 }
 0x2fa   :  { %2225 = vmatmul.mubr.f32.gmra.mrb[76].mxu1 %v2638_v1 }
 0x2fc   :  { %v2640_v2 = vpop.eup %2639 }
 0x2fd   :  { %v2642_v3 = vpop.eup %2641  ;;  %2227 = vmatprep.mubr.f32.mxu1 %v2640_v2 }
 0x2fe   :  { %2228 = vmatmul.mubr.f32.gmra.mrb[78].mxu1 %v2642_v3 }
 0x395   :  { %v2184_v7 = vpop.f32.mrb[48].mxu1 }
 0x396   :  { %v1067_v8 = vadd.f32 %v2184_v7, %v3065_v6  ;;  %v1061_v9 = vpop.f32.mrb[49].mxu1 }
 0x397   :  { %v1062_v10 = vadd.f32 %v3065_v6, %v1061_v9 }
 0x399   :  { %2643 = vtanh.f32 %v1062_v10  ;;  %v2187_v11 = vpop.f32.mrb[50].mxu1 }
 0x39a   :  { %2645 = vtanh.f32 %v1067_v8  ;;  %v1077_v40 = vadd.f32 %v2187_v11, %v3065_v6  ;;  %v1071_v12 = vpop.f32.mrb[51].mxu1 }
 0x39b   :  { %v1072_v13 = vadd.f32 %v3065_v6, %v1071_v12 }
 0x39d   :  { %2647 = vtanh.f32 %v1072_v13  ;;  %v2190_v14 = vpop.f32.mrb[52].mxu1 }
 0x39e   :  { %2649 = vtanh.f32 %v1077_v40  ;;  %v1087_v15 = vadd.f32 %v2190_v14, %v3065_v6  ;;  %v1081_v16 = vpop.f32.mrb[53].mxu1 }
 0x39f   :  { %v1082_v17 = vadd.f32 %v3065_v6, %v1081_v16 }
 0x3a1   :  { %2651 = vtanh.f32 %v1082_v17  ;;  %v2193_v18 = vpop.f32.mrb[54].mxu1 }
 0x3a2   :  { %2653 = vtanh.f32 %v1087_v15  ;;  %v1097_v19 = vadd.f32 %v2193_v18, %v3065_v6  ;;  %v1091_v20 = vpop.f32.mrb[55].mxu1 }
 0x3a3   :  { %v2644_v21 = vpop.eup %2643  ;;  %v1092_v22 = vadd.f32 %v3065_v6, %v1091_v20 }
 0x3a4   :  { %v2646_v23 = vpop.eup %2645  ;;  %2262 = vmatprep.mubr.f32.mxu0 %v2644_v21 }
 0x3a5   :  { %2655 = vtanh.f32 %v1092_v22  ;;  %v2196_v24 = vpop.f32.mrb[56].mxu1  ;;  %2263 = vmatmul.mubr.f32.vlgmr.msra.gmra.mrb[48].mxu0 %v2646_v23 }
 0x3a6   :  { %2657 = vtanh.f32 %v1097_v19  ;;  %v1107_v25 = vadd.f32 %v2196_v24, %v3065_v6  ;;  %v1101_v26 = vpop.f32.mrb[57].mxu1 }
 0x3a7   :  { %v2648_v27 = vpop.eup %2647  ;;  %v1102_v28 = vadd.f32 %v3065_v6, %v1101_v26 }
 0x3a8   :  { %v2650_v29 = vpop.eup %2649  ;;  %2265 = vmatprep.mubr.f32.mxu0 %v2648_v27 }
 0x3a9   :  { %2659 = vtanh.f32 %v1102_v28  ;;  %v2199_v30 = vpop.f32.mrb[58].mxu1  ;;  %2266 = vmatmul.mubr.f32.gmra.mrb[50].mxu0 %v2650_v29 }
 0x3aa   :  { %2661 = vtanh.f32 %v1107_v25  ;;  %v1117_v31 = vadd.f32 %v2199_v30, %v3065_v6  ;;  %v1111_v32 = vpop.f32.mrb[59].mxu1 }
 0x3ab   :  { %v2652_v34 = vpop.eup %2651  ;;  %v1112_v35 = vadd.f32 %v3065_v6, %v1111_v32 }
 0x3ac   :  { %v2654_v36 = vpop.eup %2653  ;;  %2268 = vmatprep.mubr.f32.mxu0 %v2652_v34 }
 0x3ad   :  { %2663 = vtanh.f32 %v1112_v35  ;;  %v2202_v37 = vpop.f32.mrb[60].mxu1  ;;  %2269 = vmatmul.mubr.f32.gmra.mrb[52].mxu0 %v2654_v36 }
 0x3ae   :  { %2665 = vtanh.f32 %v1117_v31  ;;  %v1127_v38 = vadd.f32 %v2202_v37, %v3065_v6  ;;  %v1121_v39 = vpop.f32.mrb[61].mxu1 }
 0x3af   :  { %v2656_v41 = vpop.eup %2655  ;;  %v1122_v42 = vadd.f32 %v3065_v6, %v1121_v39 }
 0x3b0   :  { %v2658_v43 = vpop.eup %2657  ;;  %2271 = vmatprep.mubr.f32.mxu0 %v2656_v41  ;;  %v3099_v41 = vld [vmem:[#allocation2 + $0x228] ss:$0 sm:$0xff] }
 0x3b1   :  { %2667 = vtanh.f32 %v1122_v42  ;;  %v2205_v44 = vpop.f32.mrb[62].mxu1  ;;  %2272 = vmatmul.mubr.f32.gmra.mrb[54].mxu0 %v2658_v43 }
 0x3b2   :  { %2669 = vtanh.f32 %v1127_v38  ;;  %v1137_v45 = vadd.f32 %v2205_v44, %v3065_v6  ;;  %v1131_v46 = vpop.f32.mrb[63].mxu1 }
 0x3b3   :  { %v2660_v47 = vpop.eup %2659  ;;  %v1132_v48 = vadd.f32 %v3065_v6, %v1131_v46 }
 0x3b4   :  { %v2662_v49 = vpop.eup %2661  ;;  %2274 = vmatprep.mubr.f32.mxu0 %v2660_v47 }
 0x3b5   :  { %2671 = vtanh.f32 %v1132_v48  ;;  %v2208_v50 = vpop.f32.mrb[64].mxu1  ;;  %2275 = vmatmul.mubr.f32.gmra.mrb[56].mxu0 %v2662_v49 }
 0x3b6   :  { %2673 = vtanh.f32 %v1137_v45  ;;  %v1147_v51 = vadd.f32 %v2208_v50, %v3065_v6  ;;  %v1141_v52 = vpop.f32.mrb[65].mxu1 }
 0x3b7   :  { %v2664_v53 = vpop.eup %2663  ;;  %v1142_v54 = vadd.f32 %v3065_v6, %v1141_v52 }
 0x3b8   :  { %v2666_v55 = vpop.eup %2665  ;;  %2277 = vmatprep.mubr.f32.mxu0 %v2664_v53 }
 0x3b9   :  { %2675 = vtanh.f32 %v1142_v54  ;;  %v2211_v56 = vpop.f32.mrb[66].mxu1  ;;  %2278 = vmatmul.mubr.f32.gmra.mrb[58].mxu0 %v2666_v55 }
 0x3ba   :  { %2677 = vtanh.f32 %v1147_v51  ;;  %v1157_v57 = vadd.f32 %v2211_v56, %v3065_v6  ;;  %v1151_v58 = vpop.f32.mrb[67].mxu1 }
 0x3bb   :  { %v2668_v59 = vpop.eup %2667  ;;  %v1152_v60 = vadd.f32 %v3065_v6, %v1151_v58 }
 0x3bc   :  { %v2670_v61 = vpop.eup %2669  ;;  %2280 = vmatprep.mubr.f32.mxu0 %v2668_v59 }
 0x3bd   :  { %2679 = vtanh.f32 %v1152_v60  ;;  %v2214_v62 = vpop.f32.mrb[68].mxu1  ;;  %2281 = vmatmul.mubr.f32.gmra.mrb[60].mxu0 %v2670_v61 }
 0x3be   :  { %2681 = vtanh.f32 %v1157_v57  ;;  %v1167_v63 = vadd.f32 %v2214_v62, %v3065_v6  ;;  %v1161_v0 = vpop.f32.mrb[69].mxu1 }
 0x3bf   :  { %v2672_v1 = vpop.eup %2671  ;;  %v1162_v2 = vadd.f32 %v3065_v6, %v1161_v0 }
 0x3c0   :  { %v2674_v3 = vpop.eup %2673  ;;  %2283 = vmatprep.mubr.f32.mxu0 %v2672_v1 }
 0x3c1   :  { %2683 = vtanh.f32 %v1162_v2  ;;  %v2217_v4 = vpop.f32.mrb[70].mxu1  ;;  %2284 = vmatmul.mubr.f32.gmra.mrb[62].mxu0 %v2674_v3 }
 0x3c2   :  { %2685 = vtanh.f32 %v1167_v63  ;;  %v1177_v5 = vadd.f32 %v2217_v4, %v3065_v6  ;;  %v1171_v33 = vpop.f32.mrb[71].mxu1 }
 0x3c3   :  { %v2676_v7 = vpop.eup %2675  ;;  %v1172_v8 = vadd.f32 %v3065_v6, %v1171_v33 }
 0x3c4   :  { %v2678_v9 = vpop.eup %2677  ;;  %2286 = vmatprep.mubr.f32.mxu0 %v2676_v7 }
 0x3c5   :  { %2687 = vtanh.f32 %v1172_v8  ;;  %v2220_v10 = vpop.f32.mrb[72].mxu1  ;;  %2287 = vmatmul.mubr.f32.gmra.mrb[64].mxu0 %v2678_v9 }
 0x3c6   :  { %2689 = vtanh.f32 %v1177_v5  ;;  %v1187_v11 = vadd.f32 %v2220_v10, %v3065_v6  ;;  %v1181_v40 = vpop.f32.mrb[73].mxu1 }
 0x3c7   :  { %v2680_v12 = vpop.eup %2679  ;;  %v1182_v13 = vadd.f32 %v3065_v6, %v1181_v40 }
 0x3c8   :  { %v2682_v14 = vpop.eup %2681  ;;  %2289 = vmatprep.mubr.f32.mxu0 %v2680_v12 }
 0x3c9   :  { %2691 = vtanh.f32 %v1182_v13  ;;  %v2223_v15 = vpop.f32.mrb[74].mxu1  ;;  %2290 = vmatmul.mubr.f32.gmra.mrb[66].mxu0 %v2682_v14 }
 0x3ca   :  { %2693 = vtanh.f32 %v1187_v11  ;;  %v1197_v16 = vadd.f32 %v2223_v15, %v3065_v6  ;;  %v1191_v17 = vpop.f32.mrb[75].mxu1 }
 0x3cb   :  { %v2684_v18 = vpop.eup %2683  ;;  %v1192_v19 = vadd.f32 %v3065_v6, %v1191_v17 }
 0x3cc   :  { %v2686_v20 = vpop.eup %2685  ;;  %2292 = vmatprep.mubr.f32.mxu0 %v2684_v18 }
 0x3cd   :  { %2695 = vtanh.f32 %v1192_v19  ;;  %v2226_v21 = vpop.f32.mrb[76].mxu1  ;;  %2293 = vmatmul.mubr.f32.gmra.mrb[68].mxu0 %v2686_v20 }
 0x3ce   :  { %2697 = vtanh.f32 %v1197_v16  ;;  %v1207_v22 = vadd.f32 %v2226_v21, %v3065_v6  ;;  %v1201_v23 = vpop.f32.mrb[77].mxu1 }
 0x3cf   :  { %v2688_v24 = vpop.eup %2687  ;;  %v1202_v25 = vadd.f32 %v3065_v6, %v1201_v23 }
 0x3d0   :  { %v2690_v26 = vpop.eup %2689  ;;  %2295 = vmatprep.mubr.f32.mxu0 %v2688_v24 }
 0x3d1   :  { %2699 = vtanh.f32 %v1202_v25  ;;  %v2229_v27 = vpop.f32.mrb[78].mxu1  ;;  %2296 = vmatmul.mubr.f32.gmra.mrb[70].mxu0 %v2690_v26 }
 0x3d2   :  { %2701 = vtanh.f32 %v1207_v22  ;;  %v1217_v28 = vadd.f32 %v2229_v27, %v3065_v6  ;;  %v1211_v29 = vpop.f32.mrb[79].mxu1 }
 0x3d3   :  { %v2692_v30 = vpop.eup %2691  ;;  %v1212_v31 = vadd.f32 %v3065_v6, %v1211_v29 }
 0x3d4   :  { %v2694_v32 = vpop.eup %2693  ;;  %2298 = vmatprep.mubr.f32.mxu0 %v2692_v30 }
 0x3d5   :  { %2703 = vtanh.f32 %v1212_v31  ;;  %2299 = vmatmul.mubr.f32.gmra.mrb[72].mxu0 %v2694_v32 }
 0x3d6   :  { %2705 = vtanh.f32 %v1217_v28 }
 0x3d7   :  { %v2696_v34 = vpop.eup %2695 }
 0x3d8   :  { %v2698_v35 = vpop.eup %2697  ;;  %2301 = vmatprep.mubr.f32.mxu0 %v2696_v34 }
 0x3d9   :  { %2302 = vmatmul.mubr.f32.gmra.mrb[74].mxu0 %v2698_v35 }
 0x3db   :  { %v2700_v36 = vpop.eup %2699 }
 0x3dc   :  { %v2702_v37 = vpop.eup %2701  ;;  %2304 = vmatprep.mubr.f32.mxu0 %v2700_v36 }
 0x3dd   :  { %2305 = vmatmul.mubr.f32.gmra.mrb[76].mxu0 %v2702_v37 }
 0x3df   :  { %v2704_v38 = vpop.eup %2703 }
 0x3e0   :  { %v2706_v39 = vpop.eup %2705  ;;  %2307 = vmatprep.mubr.f32.mxu0 %v2704_v38 }
 0x3e1   :  { %2308 = vmatmul.mubr.f32.gmra.mrb[78].mxu0 %v2706_v39 }
 0x478   :  { %v2264_v6 = vpop.f32.mrb[48].mxu0 }
 0x479   :  { %v1345_v42 = vadd.f32 %v2264_v6, %v3099_v41  ;;  %v1339_v43 = vpop.f32.mrb[49].mxu0 }
 0x47a   :  { %v1340_v44 = vadd.f32 %v3099_v41, %v1339_v43 }
 0x47b   :  { %v1499_v45 = vmul.f32 0.5, %v1345_v42 }
 0x47c   :  { %v1498_v46 = vmul.f32 0.5, %v1340_v44  ;;  %v2267_v47 = vpop.f32.mrb[50].mxu0 }
 0x47d   :  { %2707 = vtanh.f32 %v1499_v45  ;;  %v1355_v48 = vadd.f32 %v2267_v47, %v3099_v41  ;;  %v1349_v49 = vpop.f32.mrb[51].mxu0 }
 0x47e   :  { %2709 = vtanh.f32 %v1498_v46  ;;  %v1350_v50 = vadd.f32 %v3099_v41, %v1349_v49 }
 0x47f   :  { %v1501_v51 = vmul.f32 0.5, %v1355_v48 }
 0x480   :  { %v1500_v52 = vmul.f32 0.5, %v1350_v50  ;;  %v2270_v53 = vpop.f32.mrb[52].mxu0 }
 0x481   :  { %2711 = vtanh.f32 %v1501_v51  ;;  %v1365_v54 = vadd.f32 %v2270_v53, %v3099_v41  ;;  %v1359_v55 = vpop.f32.mrb[53].mxu0 }
 0x482   :  { %2713 = vtanh.f32 %v1500_v52  ;;  %v1360_v56 = vadd.f32 %v3099_v41, %v1359_v55 }
 0x483   :  { %v1503_v57 = vmul.f32 0.5, %v1365_v54 }
 0x484   :  { %v1502_v58 = vmul.f32 0.5, %v1360_v56  ;;  %v2273_v59 = vpop.f32.mrb[54].mxu0 }
 0x485   :  { %2715 = vtanh.f32 %v1503_v57  ;;  %v1375_v60 = vadd.f32 %v2273_v59, %v3099_v41  ;;  %v1369_v61 = vpop.f32.mrb[55].mxu0 }
 0x486   :  { %2717 = vtanh.f32 %v1502_v58  ;;  %v1370_v62 = vadd.f32 %v3099_v41, %v1369_v61 }
 0x487   :  { %v2708_v63 = vpop.eup %2707  ;;  %v1505_v0 = vmul.f32 0.5, %v1375_v60 }
 0x488   :  { %v2710_v1 = vpop.eup %2709  ;;  %v1563_v2 = vadd.f32 1.0, %v2708_v63  ;;  %v1504_v3 = vmul.f32 0.5, %v1370_v62  ;;  %v2276_v4 = vpop.f32.mrb[56].mxu0 }
 0x489   :  { %v1562_v5 = vadd.f32 1.0, %v2710_v1  ;;  %2719 = vtanh.f32 %v1505_v0  ;;  %v1385_v33 = vadd.f32 %v2276_v4, %v3099_v41  ;;  %v1379_v7 = vpop.f32.mrb[57].mxu0 }
 0x48a   :  { %v1595_v8 = vmul.f32 0.5, %v1563_v2  ;;  %2721 = vtanh.f32 %v1504_v3  ;;  %v1380_v9 = vadd.f32 %v3099_v41, %v1379_v7 }
 0x48b   :  { %v2712_v10 = vpop.eup %2711  ;;  %v1594_v11 = vmul.f32 0.5, %v1562_v5  ;;  %v1507_v40 = vmul.f32 0.5, %v1385_v33 }
 0x48c   :  { %v2714_v12 = vpop.eup %2713  ;;  %1627 = vst [vmem:[#allocation5 + $0x8] sm:$0xff] %v1595_v8  ;;  %v1565_v13 = vadd.f32 1.0, %v2712_v10  ;;  %v1506_v14 = vmul.f32 0.5, %v1380_v9  ;;  %v2279_v15 = vpop.f32.mrb[58].mxu0 }
 0x48d   :  { %1626 = vst [vmem:[#allocation5] sm:$0xff] %v1594_v11  ;;  %v1564_v16 = vadd.f32 1.0, %v2714_v12  ;;  %2723 = vtanh.f32 %v1507_v40  ;;  %v1395_v17 = vadd.f32 %v2279_v15, %v3099_v41  ;;  %v1389_v18 = vpop.f32.mrb[59].mxu0 }
 0x48e   :  { %v1597_v19 = vmul.f32 0.5, %v1565_v13  ;;  %2725 = vtanh.f32 %v1506_v14  ;;  %v1390_v20 = vadd.f32 %v3099_v41, %v1389_v18 }
 0x48f   :  { %v2716_v21 = vpop.eup %2715  ;;  %v1596_v22 = vmul.f32 0.5, %v1564_v16  ;;  %v1509_v23 = vmul.f32 0.5, %v1395_v17 }
 0x490   :  { %v2718_v24 = vpop.eup %2717  ;;  %1629 = vst [vmem:[#allocation5 + $0x18] sm:$0xff] %v1597_v19  ;;  %v1567_v25 = vadd.f32 1.0, %v2716_v21  ;;  %v1508_v26 = vmul.f32 0.5, %v1390_v20  ;;  %v2282_v27 = vpop.f32.mrb[60].mxu0 }
 0x491   :  { %1628 = vst [vmem:[#allocation5 + $0x10] sm:$0xff] %v1596_v22  ;;  %v1566_v28 = vadd.f32 1.0, %v2718_v24  ;;  %2727 = vtanh.f32 %v1509_v23  ;;  %v1405_v29 = vadd.f32 %v2282_v27, %v3099_v41  ;;  %v1399_v30 = vpop.f32.mrb[61].mxu0 }
 0x492   :  { %v1599_v31 = vmul.f32 0.5, %v1567_v25  ;;  %2729 = vtanh.f32 %v1508_v26  ;;  %v1400_v32 = vadd.f32 %v3099_v41, %v1399_v30 }
 0x493   :  { %v2720_v34 = vpop.eup %2719  ;;  %v1598_v35 = vmul.f32 0.5, %v1566_v28  ;;  %v1511_v36 = vmul.f32 0.5, %v1405_v29 }
 0x494   :  { %v2722_v37 = vpop.eup %2721  ;;  %1631 = vst [vmem:[#allocation5 + $0x28] sm:$0xff] %v1599_v31  ;;  %v1569_v38 = vadd.f32 1.0, %v2720_v34  ;;  %v1510_v39 = vmul.f32 0.5, %v1400_v32  ;;  %v2285_v6 = vpop.f32.mrb[62].mxu0 }
 0x495   :  { %1630 = vst [vmem:[#allocation5 + $0x20] sm:$0xff] %v1598_v35  ;;  %v1568_v42 = vadd.f32 1.0, %v2722_v37  ;;  %2731 = vtanh.f32 %v1511_v36  ;;  %v1415_v43 = vadd.f32 %v2285_v6, %v3099_v41  ;;  %v1409_v44 = vpop.f32.mrb[63].mxu0 }
 0x496   :  { %v1601_v45 = vmul.f32 0.5, %v1569_v38  ;;  %2733 = vtanh.f32 %v1510_v39  ;;  %v1410_v46 = vadd.f32 %v3099_v41, %v1409_v44 }
 0x497   :  { %v2724_v47 = vpop.eup %2723  ;;  %v1600_v48 = vmul.f32 0.5, %v1568_v42  ;;  %v1513_v49 = vmul.f32 0.5, %v1415_v43 }
 0x498   :  { %v2726_v50 = vpop.eup %2725  ;;  %1633 = vst [vmem:[#allocation5 + $0x38] sm:$0xff] %v1601_v45  ;;  %v1571_v51 = vadd.f32 1.0, %v2724_v47  ;;  %v1512_v52 = vmul.f32 0.5, %v1410_v46  ;;  %v2288_v53 = vpop.f32.mrb[64].mxu0 }
 0x499   :  { %1632 = vst [vmem:[#allocation5 + $0x30] sm:$0xff] %v1600_v48  ;;  %v1570_v54 = vadd.f32 1.0, %v2726_v50  ;;  %2735 = vtanh.f32 %v1513_v49  ;;  %v1425_v55 = vadd.f32 %v2288_v53, %v3099_v41  ;;  %v1419_v56 = vpop.f32.mrb[65].mxu0 }
 0x49a   :  { %v1603_v57 = vmul.f32 0.5, %v1571_v51  ;;  %2737 = vtanh.f32 %v1512_v52  ;;  %v1420_v58 = vadd.f32 %v3099_v41, %v1419_v56 }
 0x49b   :  { %v2728_v59 = vpop.eup %2727  ;;  %v1602_v60 = vmul.f32 0.5, %v1570_v54  ;;  %v1515_v61 = vmul.f32 0.5, %v1425_v55 }
 0x49c   :  { %v2730_v62 = vpop.eup %2729  ;;  %1635 = vst [vmem:[#allocation5 + $0x48] sm:$0xff] %v1603_v57  ;;  %v1573_v63 = vadd.f32 1.0, %v2728_v59  ;;  %v1514_v0 = vmul.f32 0.5, %v1420_v58  ;;  %v2291_v1 = vpop.f32.mrb[66].mxu0 }
 0x49d   :  { %1634 = vst [vmem:[#allocation5 + $0x40] sm:$0xff] %v1602_v60  ;;  %v1572_v2 = vadd.f32 1.0, %v2730_v62  ;;  %2739 = vtanh.f32 %v1515_v61  ;;  %v1435_v3 = vadd.f32 %v2291_v1, %v3099_v41  ;;  %v1429_v4 = vpop.f32.mrb[67].mxu0 }
 0x49e   :  { %v1605_v5 = vmul.f32 0.5, %v1573_v63  ;;  %2741 = vtanh.f32 %v1514_v0  ;;  %v1430_v33 = vadd.f32 %v3099_v41, %v1429_v4 }
 0x49f   :  { %v2732_v7 = vpop.eup %2731  ;;  %v1604_v8 = vmul.f32 0.5, %v1572_v2  ;;  %v1517_v9 = vmul.f32 0.5, %v1435_v3 }
 0x4a0   :  { %v2734_v10 = vpop.eup %2733  ;;  %1637 = vst [vmem:[#allocation5 + $0x58] sm:$0xff] %v1605_v5  ;;  %v1575_v11 = vadd.f32 1.0, %v2732_v7  ;;  %v1516_v40 = vmul.f32 0.5, %v1430_v33  ;;  %v2294_v12 = vpop.f32.mrb[68].mxu0 }
 0x4a1   :  { %1636 = vst [vmem:[#allocation5 + $0x50] sm:$0xff] %v1604_v8  ;;  %v1574_v13 = vadd.f32 1.0, %v2734_v10  ;;  %2743 = vtanh.f32 %v1517_v9  ;;  %v1445_v14 = vadd.f32 %v2294_v12, %v3099_v41  ;;  %v1439_v15 = vpop.f32.mrb[69].mxu0 }
 0x4a2   :  { %v1607_v16 = vmul.f32 0.5, %v1575_v11  ;;  %2745 = vtanh.f32 %v1516_v40  ;;  %v1440_v17 = vadd.f32 %v3099_v41, %v1439_v15 }
 0x4a3   :  { %v2736_v18 = vpop.eup %2735  ;;  %v1606_v19 = vmul.f32 0.5, %v1574_v13  ;;  %v1519_v20 = vmul.f32 0.5, %v1445_v14 }
 0x4a4   :  { %v2738_v21 = vpop.eup %2737  ;;  %1639 = vst [vmem:[#allocation5 + $0x68] sm:$0xff] %v1607_v16  ;;  %v1577_v22 = vadd.f32 1.0, %v2736_v18  ;;  %v1518_v23 = vmul.f32 0.5, %v1440_v17  ;;  %v2297_v24 = vpop.f32.mrb[70].mxu0 }
 0x4a5   :  { %1638 = vst [vmem:[#allocation5 + $0x60] sm:$0xff] %v1606_v19  ;;  %v1576_v25 = vadd.f32 1.0, %v2738_v21  ;;  %2747 = vtanh.f32 %v1519_v20  ;;  %v1455_v26 = vadd.f32 %v2297_v24, %v3099_v41  ;;  %v1449_v27 = vpop.f32.mrb[71].mxu0 }
 0x4a6   :  { %v1609_v28 = vmul.f32 0.5, %v1577_v22  ;;  %2749 = vtanh.f32 %v1518_v23  ;;  %v1450_v29 = vadd.f32 %v3099_v41, %v1449_v27 }
 0x4a7   :  { %v2740_v30 = vpop.eup %2739  ;;  %v1608_v31 = vmul.f32 0.5, %v1576_v25  ;;  %v1521_v32 = vmul.f32 0.5, %v1455_v26 }
 0x4a8   :  { %v2742_v34 = vpop.eup %2741  ;;  %1641 = vst [vmem:[#allocation5 + $0x78] sm:$0xff] %v1609_v28  ;;  %v1579_v35 = vadd.f32 1.0, %v2740_v30  ;;  %v1520_v36 = vmul.f32 0.5, %v1450_v29  ;;  %v2300_v37 = vpop.f32.mrb[72].mxu0 }
 0x4a9   :  { %1640 = vst [vmem:[#allocation5 + $0x70] sm:$0xff] %v1608_v31  ;;  %v1578_v38 = vadd.f32 1.0, %v2742_v34  ;;  %2751 = vtanh.f32 %v1521_v32  ;;  %v1465_v39 = vadd.f32 %v2300_v37, %v3099_v41  ;;  %v1459_v6 = vpop.f32.mrb[73].mxu0 }
 0x4aa   :  { %v1611_v42 = vmul.f32 0.5, %v1579_v35  ;;  %2753 = vtanh.f32 %v1520_v36  ;;  %v1460_v43 = vadd.f32 %v3099_v41, %v1459_v6 }
 0x4ab   :  { %v2744_v44 = vpop.eup %2743  ;;  %v1610_v45 = vmul.f32 0.5, %v1578_v38  ;;  %v1523_v46 = vmul.f32 0.5, %v1465_v39 }
 0x4ac   :  { %v2746_v47 = vpop.eup %2745  ;;  %1643 = vst [vmem:[#allocation5 + $0x88] sm:$0xff] %v1611_v42  ;;  %v1581_v48 = vadd.f32 1.0, %v2744_v44  ;;  %v1522_v49 = vmul.f32 0.5, %v1460_v43  ;;  %v2303_v50 = vpop.f32.mrb[74].mxu0 }
 0x4ad   :  { %1642 = vst [vmem:[#allocation5 + $0x80] sm:$0xff] %v1610_v45  ;;  %v1580_v51 = vadd.f32 1.0, %v2746_v47  ;;  %2755 = vtanh.f32 %v1523_v46  ;;  %v1475_v52 = vadd.f32 %v2303_v50, %v3099_v41  ;;  %v1469_v53 = vpop.f32.mrb[75].mxu0 }
 0x4ae   :  { %v1613_v54 = vmul.f32 0.5, %v1581_v48  ;;  %2757 = vtanh.f32 %v1522_v49  ;;  %v1470_v55 = vadd.f32 %v3099_v41, %v1469_v53 }
 0x4af   :  { %v2748_v56 = vpop.eup %2747  ;;  %v1612_v57 = vmul.f32 0.5, %v1580_v51  ;;  %v1525_v58 = vmul.f32 0.5, %v1475_v52 }
 0x4b0   :  { %v2750_v59 = vpop.eup %2749  ;;  %1645 = vst [vmem:[#allocation5 + $0x98] sm:$0xff] %v1613_v54  ;;  %v1583_v60 = vadd.f32 1.0, %v2748_v56  ;;  %v1524_v61 = vmul.f32 0.5, %v1470_v55  ;;  %v2306_v62 = vpop.f32.mrb[76].mxu0 }
 0x4b1   :  { %1644 = vst [vmem:[#allocation5 + $0x90] sm:$0xff] %v1612_v57  ;;  %v1582_v63 = vadd.f32 1.0, %v2750_v59  ;;  %2759 = vtanh.f32 %v1525_v58  ;;  %v1485_v0 = vadd.f32 %v2306_v62, %v3099_v41  ;;  %v1479_v1 = vpop.f32.mrb[77].mxu0 }
 0x4b2   :  { %v1615_v2 = vmul.f32 0.5, %v1583_v60  ;;  %2761 = vtanh.f32 %v1524_v61  ;;  %v1480_v3 = vadd.f32 %v3099_v41, %v1479_v1 }
 0x4b3   :  { %v2752_v4 = vpop.eup %2751  ;;  %v1614_v5 = vmul.f32 0.5, %v1582_v63  ;;  %v1527_v33 = vmul.f32 0.5, %v1485_v0 }
 0x4b4   :  { %v2754_v7 = vpop.eup %2753  ;;  %1647 = vst [vmem:[#allocation5 + $0xa8] sm:$0xff] %v1615_v2  ;;  %v1585_v8 = vadd.f32 1.0, %v2752_v4  ;;  %v1526_v9 = vmul.f32 0.5, %v1480_v3  ;;  %v2309_v10 = vpop.f32.mrb[78].mxu0 }
 0x4b5   :  { %1646 = vst [vmem:[#allocation5 + $0xa0] sm:$0xff] %v1614_v5  ;;  %v1584_v11 = vadd.f32 1.0, %v2754_v7  ;;  %2763 = vtanh.f32 %v1527_v33  ;;  %v1495_v40 = vadd.f32 %v2309_v10, %v3099_v41  ;;  %v1489_v12 = vpop.f32.mrb[79].mxu0 }
 0x4b6   :  { %v1617_v13 = vmul.f32 0.5, %v1585_v8  ;;  %2765 = vtanh.f32 %v1526_v9  ;;  %v1490_v14 = vadd.f32 %v3099_v41, %v1489_v12 }
 0x4b7   :  { %v2756_v15 = vpop.eup %2755  ;;  %v1616_v16 = vmul.f32 0.5, %v1584_v11  ;;  %v1529_v17 = vmul.f32 0.5, %v1495_v40 }
 0x4b8   :  { %v2758_v18 = vpop.eup %2757  ;;  %1649 = vst [vmem:[#allocation5 + $0xb8] sm:$0xff] %v1617_v13  ;;  %v1587_v19 = vadd.f32 1.0, %v2756_v15  ;;  %v1528_v20 = vmul.f32 0.5, %v1490_v14 }
 0x4b9   :  { %1648 = vst [vmem:[#allocation5 + $0xb0] sm:$0xff] %v1616_v16  ;;  %v1586_v21 = vadd.f32 1.0, %v2758_v18  ;;  %2767 = vtanh.f32 %v1529_v17 }
 0x4ba   :  { %v1619_v22 = vmul.f32 0.5, %v1587_v19  ;;  %2769 = vtanh.f32 %v1528_v20 }
 0x4bb   :  { %v2760_v23 = vpop.eup %2759  ;;  %v1618_v24 = vmul.f32 0.5, %v1586_v21 }
 0x4bc   :  { %v2762_v25 = vpop.eup %2761  ;;  %1651 = vst [vmem:[#allocation5 + $0xc8] sm:$0xff] %v1619_v22  ;;  %v1589_v26 = vadd.f32 1.0, %v2760_v23 }
 0x4bd   :  { %1650 = vst [vmem:[#allocation5 + $0xc0] sm:$0xff] %v1618_v24  ;;  %v1588_v27 = vadd.f32 1.0, %v2762_v25 }
 0x4be   :  { %v1621_v41 = vmul.f32 0.5, %v1589_v26 }
 0x4bf   :  { %v2764_v28 = vpop.eup %2763  ;;  %v1620_v29 = vmul.f32 0.5, %v1588_v27 }
 0x4c0   :  { %v2766_v30 = vpop.eup %2765  ;;  %1653 = vst [vmem:[#allocation5 + $0xd8] sm:$0xff] %v1621_v41  ;;  %v1591_v31 = vadd.f32 1.0, %v2764_v28 }
 0x4c1   :  { %1652 = vst [vmem:[#allocation5 + $0xd0] sm:$0xff] %v1620_v29  ;;  %v1590_v32 = vadd.f32 1.0, %v2766_v30 }
 0x4c2   :  { %v1623_v34 = vmul.f32 0.5, %v1591_v31 }
 0x4c3   :  { %v2768_v35 = vpop.eup %2767  ;;  %v1622_v36 = vmul.f32 0.5, %v1590_v32 }
 0x4c4   :  { %v2770_v37 = vpop.eup %2769  ;;  %1655 = vst [vmem:[#allocation5 + $0xe8] sm:$0xff] %v1623_v34  ;;  %v1593_v38 = vadd.f32 1.0, %v2768_v35 }
 0x4c5   :  { %1654 = vst [vmem:[#allocation5 + $0xe0] sm:$0xff] %v1622_v36  ;;  %v1592_v39 = vadd.f32 1.0, %v2770_v37 }
 0x4c6   :  { %v1625_v6 = vmul.f32 0.5, %v1593_v38 }
 0x4c7   :  { %v1624_v42 = vmul.f32 0.5, %v1592_v39 }
 0x4c8   :  { %1657 = vst [vmem:[#allocation5 + $0xf8] sm:$0xff] %v1625_v6 }
 0x4c9   :  { %1656 = vst [vmem:[#allocation5 + $0xf0] sm:$0xff] %v1624_v42 }
 0x4ca   :  { %2804 = shalt.err (!%p2801_p12)
}
 0x4cb   :  { %s2805_s8 = scalar_lea.hbm %s3150_s2, 4096 }
 0x4cc   :  { %p2806_p13 = scmp.ne.s32.totalorder %s3150_s2, %s2805_s8  ;;  %p2809_p0 = scmp.lt.u32.totalorder %s2805_s8, %s3150_s2 }
 0x4ce   :  { %p2811_p1 = pnand %p2809_p0, %p2806_p13 }
 0x4d0   :  { %2814 = shalt.err (!%p2811_p1)
}
 0x4d1   :  { %1669 = dma.vmem_to_hbm [thread:$0]  %s1664_s4, 4096, %s3150_s2, [#allocation4], %s2820_s19, %s2820_s19, %s2821_s20  }
 0x4d2   :  { %2817 = dma.done.wait [#allocation4], 4096  }
 0x4d3   :  { %2818 = vsyncadd [#allocation4], 4294963200 }
 0x4d4   :  { %1673 = vsyncpa [#allocation3], 1 }
 0x4d5   :  { %1674 = vsyncpa [#allocation4], 1 }

</bundles_post_ra>
